<compile_context>
chip_gen: v7x
topology: tpu7x:2x2x1
jax: 0.10.0
libtpu: 0.0.40
codegen_flags: <defaults>
</compile_context>

<pallas_src>
import functools

import jax
import jax.numpy as jnp
from jax import lax
from jax.experimental import pallas as pl
from jax.experimental.pallas import tpu as pltpu


def _round_up(x, mult):
    return (x + mult - 1) // mult * mult


def _default_vmem_limit_bytes():
    # ~48 MiB on v7x (64 MiB/TC), ~96 MiB on v5e/v6e (128 MiB).
    cap = 64 * 1024 * 1024
    try:
        cap = int(pltpu.get_tpu_info().vmem_capacity_bytes)
    except Exception:
        pass
    return max(32 * 1024 * 1024, min(cap * 3 // 4, 96 * 1024 * 1024))


def _derive_tm(m, kt, cpad, bytes_c, vmem_limit):
    """Largest row tile satisfying the double-buffered VMEM budget of both passes."""
    budget = int(vmem_limit * 0.85)                    # headroom for Mosaic scratch
    # pass 1: 2x patches blk + 2x weight blk + 2x yc out blk + sum/ssq blks + f32 acc
    fixed1 = 2 * kt * cpad * bytes_c + 2 * 2 * 8 * cpad * 4
    per_row1 = 2 * kt * bytes_c + 2 * cpad * bytes_c + cpad * 4
    # pass 2: 2x yc in blk + 2x out blk (f32) + scale/shift rows
    fixed2 = 2 * 2 * cpad * 4
    per_row2 = 2 * cpad * bytes_c + 2 * cpad * 4
    tm1 = (budget - fixed1) // per_row1
    tm2 = (budget - fixed2) // per_row2
    tm = min(tm1, tm2, 2048, _round_up(m, 8))
    tm = max(16, (tm // 16) * 16)                      # bf16-safe sublane multiple
    return int(tm)


# ---------------------------------------------------------------------------
# Pass 1: conv tile (K-tiled matmul with f32 VMEM accumulator).  At the last K
# step the block writes (a) the bias-free conv output yc to its HBM cache slab
# and (b) per-block partial channel sums / sums-of-squares.  Each grid block
# owns its own (8, Cpad) partial slab, so the M axis is "parallel" (megacore
# safe) and the reduction is hierarchical (block partials -> f32 sum in the
# wrapper).  The full matmul is executed exactly once per layer.
# ---------------------------------------------------------------------------
def _conv_stats_kernel(p_ref, w_ref, yc_ref, sum_ref, ssq_ref, acc_ref):
    kk = pl.program_id(1)

    @pl.when(kk == 0)
    def _():
        acc_ref[...] = jnp.zeros_like(acc_ref)

    acc_ref[...] += jnp.dot(p_ref[...], w_ref[...],
                            preferred_element_type=jnp.float32)

    @pl.when(kk == pl.num_programs(1) - 1)
    def _():
        yc = acc_ref[...]                              # (tm, Cpad) f32
        yc_ref[...] = yc.astype(yc_ref.dtype)
        y3 = yc.reshape(-1, 8, yc.shape[-1])           # native (8,128) re-tiling
        sum_ref[...] = jnp.sum(y3, axis=0)             # VPU-only partial reduce
        ssq_ref[...] = jnp.sum(y3 * y3, axis=0)


# ---------------------------------------------------------------------------
# Pass 2: elementwise BatchNorm affine + ReLU over the cached yc (no matmul,
# no patches re-read).  Scale/shift are applied in f32, lane-dense output.
# ---------------------------------------------------------------------------
def _bn_relu_kernel(yc_ref, scale_ref, shift_ref, o_ref):
    y = yc_ref[...].astype(jnp.float32)
    o_ref[...] = jnp.maximum(y * scale_ref[...] + shift_ref[...], 0.0
                             ).astype(o_ref.dtype)


@functools.partial(
    jax.jit,
    static_argnames=("stride", "padding", "eps", "tm", "compute_dtype",
                     "vmem_limit_bytes", "out_dtype"))
def basic_conv2d(x, weight, bias, gamma, beta, *, stride=1, padding=1,
                 eps=1e-3, tm=None, compute_dtype=jnp.bfloat16,
                 vmem_limit_bytes=None, out_dtype=jnp.float32):
    """x: NCHW f32.  weight: (Cout, Cin, kh, kw).  Returns NCHW out_dtype.

    compute_dtype controls the MXU operand / yc-cache dtype (bf16 default;
    accumulation is always f32).  tm=None derives the row tile from the VMEM
    budget; vmem_limit_bytes=None derives the budget from the chip.
    """
    n, cin, h, w = x.shape
    cout, cin_w, kh, kw = weight.shape
    assert cin == cin_w

    # ---- im2col (channels-last, feature dim ordered (ci, kh, kw)) -----------
    if kh == 1 and kw == 1 and stride == 1 and padding == 0:
        # 1x1 conv: patches is just a channels-last view of x.
        patches = x.transpose(0, 2, 3, 1)              # (N, H, W, Cin)
        oh, ow, k = h, w, cin
    else:
        patches = lax.conv_general_dilated_patches(
            x, filter_shape=(kh, kw), window_strides=(stride, stride),
            padding=[(padding, padding), (padding, padding)],
            dimension_numbers=("NCHW", "OIHW", "NHWC"))
        _, oh, ow, k = patches.shape
        assert k == cin * kh * kw
    m = n * oh * ow

    # ---- tiling / padding ----------------------------------------------------
    cpad = _round_up(cout, 128)                        # lane-dense output columns
    if k <= 1024:                                      # whole K resident per step
        kt, kpad = k, k
    else:                                              # K-tiled ('arbitrary' axis)
        kt = 512
        kpad = _round_up(k, kt)
    nkblk = kpad // kt

    bytes_c = jnp.dtype(compute_dtype).itemsize
    vmem_limit = vmem_limit_bytes or _default_vmem_limit_bytes()
    if tm is None:
        tm = _derive_tm(m, kt, cpad, bytes_c, vmem_limit)
    else:
        tm = max(16, (int(tm) // 16) * 16)
    mpad = _round_up(m, tm)
    pad_rows = mpad - m
    nblk = mpad // tm

    patches = patches.reshape(m, k)
    if pad_rows or kpad > k:
        patches = jnp.pad(patches, ((0, pad_rows), (0, kpad - k)))
    patches = patches.astype(compute_dtype)

    # PyTorch OIHW -> (Kpad, Cpad) matmul operand, zero-padded beyond (K, Cout).
    w_mat = weight.reshape(cout, k).T.astype(jnp.float32)
    w_mat = jnp.pad(w_mat, ((0, kpad - k), (0, cpad - cout))).astype(compute_dtype)
    gam = jnp.pad(gamma.astype(jnp.float32), (0, cpad - cout))
    bet = jnp.pad(beta.astype(jnp.float32), (0, cpad - cout))

    # ---- pass 1: matmul (once) + yc cache + per-block partial stats ----------
    yc, psum, pssq = pl.pallas_call(
        _conv_stats_kernel,
        out_shape=(jax.ShapeDtypeStruct((mpad, cpad), compute_dtype),
                   jax.ShapeDtypeStruct((nblk * 8, cpad), jnp.float32),
                   jax.ShapeDtypeStruct((nblk * 8, cpad), jnp.float32)),
        grid_spec=pltpu.PrefetchScalarGridSpec(
            num_scalar_prefetch=0,
            grid=(nblk, nkblk),
            in_specs=[
                pl.BlockSpec((tm, kt), lambda i, kk: (i, kk)),
                pl.BlockSpec((kt, cpad), lambda i, kk: (kk, 0)),
            ],
            out_specs=(
                pl.BlockSpec((tm, cpad), lambda i, kk: (i, 0)),
                pl.BlockSpec((8, cpad), lambda i, kk: (i, 0)),
                pl.BlockSpec((8, cpad), lambda i, kk: (i, 0)),
            ),
            scratch_shapes=[pltpu.VMEM((tm, cpad), jnp.float32)]),
        compiler_params=pltpu.CompilerParams(
            dimension_semantics=("parallel", "arbitrary"),
            vmem_limit_bytes=vmem_limit),
        cost_estimate=pl.CostEstimate(
            flops=2 * mpad * kpad * cpad, transcendentals=0,
            bytes_accessed=(mpad * kpad + kpad * cpad + mpad * cpad) * bytes_c
                           + 2 * nblk * 8 * cpad * 4),
    )(patches, w_mat)

    # ---- hierarchical f32 reduction of per-block partials ---------------------
    # Zero-padded rows/cols contribute exactly 0 (bias-free yc), so no correction.
    s = jnp.sum(psum, axis=0)
    ssq = jnp.sum(pssq, axis=0)
    mean_c = s / m                                     # mean of yc = P @ W
    var = jnp.maximum(ssq / m - mean_c * mean_c, 0.0)  # biased var (BN training)
    # TODO(synk): per-block (count, mean, M2) + Chan's combine if layers with
    # |mean| >> std show up (E[y^2]-E[y]^2 cancellation).
    inv_std = lax.rsqrt(var + eps)
    scale = gam * inv_std                              # (Cpad,)
    # Conv bias cancels exactly under training-mode BN: y - mean(y) = yc - mean(yc).
    shift = bet - mean_c * scale
    del bias  # kept in the signature for module parity; no effect on the output

    # ---- pass 2: elementwise BN affine + ReLU over the cached yc --------------
    out = pl.pallas_call(
        _bn_relu_kernel,
        out_shape=jax.ShapeDtypeStruct((mpad, cpad), out_dtype),
        grid_spec=pltpu.PrefetchScalarGridSpec(
            num_scalar_prefetch=0,
            grid=(nblk,),
            in_specs=[
                pl.BlockSpec((tm, cpad), lambda i: (i, 0)),
                pl.BlockSpec((1, cpad), lambda i: (0, 0)),
                pl.BlockSpec((1, cpad), lambda i: (0, 0)),
            ],
            out_specs=pl.BlockSpec((tm, cpad), lambda i: (i, 0))),
        compiler_params=pltpu.CompilerParams(
            dimension_semantics=("parallel",),
            vmem_limit_bytes=vmem_limit),
        cost_estimate=pl.CostEstimate(
            flops=2 * mpad * cpad, transcendentals=0,
            bytes_accessed=mpad * cpad * (bytes_c + jnp.dtype(out_dtype).itemsize)
                           + 2 * cpad * 4),
    )(yc, scale.reshape(1, cpad), shift.reshape(1, cpad))

    # (Mpad, Cpad) -> valid rows/cols -> NCHW (PyTorch layout for spec parity).
    # TODO(synk): return channels-last here and transpose once at the network
    # boundary if the surrounding graph allows it.
    return out[:m, :cout].reshape(n, oh, ow, cout).transpose(0, 3, 1, 2)


# ---------------------------------------------------------------------------
# Pure-JAX reference (mirrors PyTorch: conv2d + training-mode BN + relu)
# ---------------------------------------------------------------------------
def _reference(x, weight, bias, gamma, beta, padding=1, eps=1e-3):
    y = lax.conv_general_dilated(
        x, weight, window_strides=(1, 1),
        padding=[(padding, padding), (padding, padding)],
        dimension_numbers=("NCHW", "OIHW", "NCHW"))
    y = y + bias.reshape(1, -1, 1, 1)
    mean = jnp.mean(y, axis=(0, 2, 3), keepdims=True)
    var = jnp.mean((y - mean) ** 2, axis=(0, 2, 3), keepdims=True)  # biased
    y = (y - mean) * lax.rsqrt(var + eps)
    y = y * gamma.reshape(1, -1, 1, 1) + beta.reshape(1, -1, 1, 1)
    return jnp.maximum(y, 0.0)


if __name__ == "__main__":
    # BasicConv2d(in_channels=4, out_channels=8, kernel_size=3, padding=1)
    N, CIN, COUT, H, W, KH, KW, PAD = 2, 4, 8, 16, 16, 3, 3, 1

    key = jax.random.PRNGKey(0)
    kx, kw_, kb, kg, kbt = jax.random.split(key, 5)

    x = jax.random.normal(kx, (N, CIN, H, W), dtype=jnp.float32)
    weight = jax.random.normal(kw_, (COUT, CIN, KH, KW), dtype=jnp.float32) * 0.1
    bias = jax.random.normal(kb, (COUT,), dtype=jnp.float32) * 0.1
    gamma = 1.0 + 0.1 * jax.random.normal(kg, (COUT,), dtype=jnp.float32)
    beta = 0.1 * jax.random.normal(kbt, (COUT,), dtype=jnp.float32)

    ref = _reference(x, weight, bias, gamma, beta, padding=PAD, eps=1e-3)

    # Exact-parity path: f32 MXU operands / f32 yc cache.
    out_f32 = basic_conv2d(x, weight, bias, gamma, beta, padding=PAD, eps=1e-3,
                           compute_dtype=jnp.float32)
    out_f32 = jax.block_until_ready(out_f32)
    assert out_f32.shape == (N, COUT, H, W)
    assert jnp.allclose(out_f32, ref, rtol=1e-4, atol=1e-4), "f32 path mismatch"

    # Default fast path: bf16 MXU operands (f32 accumulation), bf16 yc cache.
    out_bf16 = basic_conv2d(x, weight, bias, gamma, beta, padding=PAD, eps=1e-3)
    out_bf16 = jax.block_until_ready(out_bf16)
    assert out_bf16.shape == (N, COUT, H, W)
    max_err = float(jnp.max(jnp.abs(out_bf16 - ref)))
    assert max_err < 5e-2, f"bf16 path error too large: {max_err}"

    print("KERNEL_OK")
</pallas_src>

<mosaic_0001>
module attributes {stable_mosaic.version = 11 : i64} {
  func.func @_conv_stats_kernel(%arg0: i32, %arg1: i32, %arg2: memref<512x36xf32, #tpu.memory_space<vmem>>, %arg3: memref<36x128xf32, #tpu.memory_space<vmem>>, %arg4: memref<512x128xf32, #tpu.memory_space<vmem>>, %arg5: memref<8x128xf32, #tpu.memory_space<vmem>>, %arg6: memref<8x128xf32, #tpu.memory_space<vmem>>, %arg7: memref<512x128xf32, #tpu.memory_space<vmem>>) attributes {dimension_semantics = [#tpu.dimension_semantics<parallel>, #tpu.dimension_semantics<arbitrary>], iteration_bounds = array<i64: 1, 1>, scalar_prefetch = 0 : i64, scratch_operands = 1 : i64, tpu.core_type = #tpu.core_type<tc>, window_params = [{transform_indices = @transform_0, window_bounds = array<i64: 512, 36>}, {transform_indices = @transform_1, window_bounds = array<i64: 36, 128>}, {transform_indices = @transform_2, window_bounds = array<i64: 512, 128>}, {transform_indices = @transform_3, window_bounds = array<i64: 8, 128>}, {transform_indices = @transform_4, window_bounds = array<i64: 8, 128>}]} {
    %c0_i32 = arith.constant 0 : i32
    %0 = arith.cmpi eq, %arg1, %c0_i32 : i32
    %1 = arith.extui %0 : i1 to i32
    %c0_i32_0 = arith.constant 0 : i32
    %2 = arith.cmpi ne, %1, %c0_i32_0 : i32
    scf.if %2 {
      %cst_10 = arith.constant 0.000000e+00 : f32
      %12 = vector.broadcast %cst_10 : f32 to vector<512x128xf32>
      %c0_11 = arith.constant 0 : index
      %c0_12 = arith.constant 0 : index
      %13 = vector.load %arg7[%c0_11, %c0_12] : memref<512x128xf32, #tpu.memory_space<vmem>>, vector<512x128xf32>
      tpu.vector_store %arg7[%c0_11, %c0_12], %12 {strides = array<i32>} : memref<512x128xf32, #tpu.memory_space<vmem>>, vector<512x128xf32>,
    } else {
    }
    %c0 = arith.constant 0 : index
    %c0_1 = arith.constant 0 : index
    %3 = vector.load %arg7[%c0, %c0_1] : memref<512x128xf32, #tpu.memory_space<vmem>>, vector<512x128xf32>
    %c0_2 = arith.constant 0 : index
    %c0_3 = arith.constant 0 : index
    %4 = vector.load %arg2[%c0_2, %c0_3] : memref<512x36xf32, #tpu.memory_space<vmem>>, vector<512x36xf32>
    %c0_4 = arith.constant 0 : index
    %c0_5 = arith.constant 0 : index
    %5 = vector.load %arg3[%c0_4, %c0_5] : memref<36x128xf32, #tpu.memory_space<vmem>>, vector<36x128xf32>
    %cst = arith.constant dense<0.000000e+00> : vector<512x128xf32>
    %6 = tpu.matmul %4, %5, %cst {dimension_numbers = #tpu.dot_dimension_numbers<[1], [0], [0], [1], [0, 0, 1, 1], [], []>} : vector<512x36xf32>, vector<36x128xf32>, vector<512x128xf32> -> vector<512x128xf32>
    %7 = arith.addf %3, %6 : vector<512x128xf32>
    %c0_6 = arith.constant 0 : index
    %c0_7 = arith.constant 0 : index
    %8 = vector.load %arg7[%c0_6, %c0_7] : memref<512x128xf32, #tpu.memory_space<vmem>>, vector<512x128xf32>
    tpu.vector_store %arg7[%c0_6, %c0_7], %7 {strides = array<i32>} : memref<512x128xf32, #tpu.memory_space<vmem>>, vector<512x128xf32>,
    %c0_i32_8 = arith.constant 0 : i32
    %9 = arith.cmpi eq, %arg1, %c0_i32_8 : i32
    %10 = arith.extui %9 : i1 to i32
    %c0_i32_9 = arith.constant 0 : i32
    %11 = arith.cmpi ne, %10, %c0_i32_9 : i32
    scf.if %11 {
      %c0_10 = arith.constant 0 : index
      %c0_11 = arith.constant 0 : index
      %12 = vector.load %arg7[%c0_10, %c0_11] : memref<512x128xf32, #tpu.memory_space<vmem>>, vector<512x128xf32>
      %c0_12 = arith.constant 0 : index
      %c0_13 = arith.constant 0 : index
      %13 = vector.load %arg4[%c0_12, %c0_13] : memref<512x128xf32, #tpu.memory_space<vmem>>, vector<512x128xf32>
      tpu.vector_store %arg4[%c0_12, %c0_13], %12 {strides = array<i32>} : memref<512x128xf32, #tpu.memory_space<vmem>>, vector<512x128xf32>,
      %14 = vector.shape_cast %12 : vector<512x128xf32> to vector<64x8x128xf32>
      %cst_14 = arith.constant dense<0.000000e+00> : vector<8x128xf32>
      %15 = vector.multi_reduction <add>, %14, %cst_14 [0] : vector<64x8x128xf32> to vector<8x128xf32>
      %c0_15 = arith.constant 0 : index
      %c0_16 = arith.constant 0 : index
      %16 = vector.load %arg5[%c0_15, %c0_16] : memref<8x128xf32, #tpu.memory_space<vmem>>, vector<8x128xf32>
      tpu.vector_store %arg5[%c0_15, %c0_16], %15 {strides = array<i32>} : memref<8x128xf32, #tpu.memory_space<vmem>>, vector<8x128xf32>,
      %17 = arith.mulf %14, %14 : vector<64x8x128xf32>
      %cst_17 = arith.constant dense<0.000000e+00> : vector<8x128xf32>
      %18 = vector.multi_reduction <add>, %17, %cst_17 [0] : vector<64x8x128xf32> to vector<8x128xf32>
      %c0_18 = arith.constant 0 : index
      %c0_19 = arith.constant 0 : index
      %19 = vector.load %arg6[%c0_18, %c0_19] : memref<8x128xf32, #tpu.memory_space<vmem>>, vector<8x128xf32>
      tpu.vector_store %arg6[%c0_18, %c0_19], %18 {strides = array<i32>} : memref<8x128xf32, #tpu.memory_space<vmem>>, vector<8x128xf32>,
    } else {
    }
    return
  }
  func.func @transform_0(%arg0: i32, %arg1: i32) -> (i32, i32) {
    %c0_i32 = arith.constant 0 : i32
    return %arg0, %arg1 : i32, i32
  }
  func.func @transform_1(%arg0: i32, %arg1: i32) -> (i32, i32) {
    %c0_i32 = arith.constant 0 : i32
    %c0_i32_0 = arith.constant 0 : i32
    return %arg1, %c0_i32 : i32, i32
  }
  func.func @transform_2(%arg0: i32, %arg1: i32) -> (i32, i32) {
    %c0_i32 = arith.constant 0 : i32
    %c0_i32_0 = arith.constant 0 : i32
    return %arg0, %c0_i32 : i32, i32
  }
  func.func @transform_3(%arg0: i32, %arg1: i32) -> (i32, i32) {
    %c0_i32 = arith.constant 0 : i32
    %c0_i32_0 = arith.constant 0 : i32
    return %arg0, %c0_i32 : i32, i32
  }
  func.func @transform_4(%arg0: i32, %arg1: i32) -> (i32, i32) {
    %c0_i32 = arith.constant 0 : i32
    %c0_i32_0 = arith.constant 0 : i32
    return %arg0, %c0_i32 : i32, i32
  }
}

module attributes {stable_mosaic.version = 11 : i64} {
  func.func @_bn_relu_kernel(%arg0: i32, %arg1: memref<512x128xf32, #tpu.memory_space<vmem>>, %arg2: memref<1x128xf32, #tpu.memory_space<vmem>>, %arg3: memref<1x128xf32, #tpu.memory_space<vmem>>, %arg4: memref<512x128xf32, #tpu.memory_space<vmem>>) attributes {dimension_semantics = [#tpu.dimension_semantics<parallel>], iteration_bounds = array<i64: 1>, scalar_prefetch = 0 : i64, scratch_operands = 0 : i64, tpu.core_type = #tpu.core_type<tc>, window_params = [{transform_indices = @transform_0, window_bounds = array<i64: 512, 128>}, {pipeline_mode = #tpu.pipeline_mode<synchronous>, transform_indices = @transform_1, window_bounds = array<i64: 1, 128>}, {pipeline_mode = #tpu.pipeline_mode<synchronous>, transform_indices = @transform_2, window_bounds = array<i64: 1, 128>}, {transform_indices = @transform_3, window_bounds = array<i64: 512, 128>}]} {
    %c0 = arith.constant 0 : index
    %c0_0 = arith.constant 0 : index
    %0 = vector.load %arg1[%c0, %c0_0] : memref<512x128xf32, #tpu.memory_space<vmem>>, vector<512x128xf32>
    %c0_1 = arith.constant 0 : index
    %c0_2 = arith.constant 0 : index
    %1 = vector.load %arg2[%c0_1, %c0_2] : memref<1x128xf32, #tpu.memory_space<vmem>>, vector<1x128xf32>
    %2 = vector.broadcast %1 : vector<1x128xf32> to vector<512x128xf32>
    %3 = arith.mulf %0, %2 : vector<512x128xf32>
    %c0_3 = arith.constant 0 : index
    %c0_4 = arith.constant 0 : index
    %4 = vector.load %arg3[%c0_3, %c0_4] : memref<1x128xf32, #tpu.memory_space<vmem>>, vector<1x128xf32>
    %5 = vector.broadcast %4 : vector<1x128xf32> to vector<512x128xf32>
    %6 = arith.addf %3, %5 : vector<512x128xf32>
    %cst = arith.constant 0.000000e+00 : f32
    %7 = vector.broadcast %cst : f32 to vector<512x128xf32>
    %8 = arith.maximumf %6, %7 : vector<512x128xf32>
    %c0_5 = arith.constant 0 : index
    %c0_6 = arith.constant 0 : index
    %9 = vector.load %arg4[%c0_5, %c0_6] : memref<512x128xf32, #tpu.memory_space<vmem>>, vector<512x128xf32>
    tpu.vector_store %arg4[%c0_5, %c0_6], %8 {strides = array<i32>} : memref<512x128xf32, #tpu.memory_space<vmem>>, vector<512x128xf32>,
    return
  }
  func.func @transform_0(%arg0: i32) -> (i32, i32) {
    %c0_i32 = arith.constant 0 : i32
    %c0_i32_0 = arith.constant 0 : i32
    return %arg0, %c0_i32 : i32, i32
  }
  func.func @transform_1(%arg0: i32) -> (i32, i32) {
    %c0_i32 = arith.constant 0 : i32
    %c0_i32_0 = arith.constant 0 : i32
    %c0_i32_1 = arith.constant 0 : i32
    return %c0_i32, %c0_i32_0 : i32, i32
  }
  func.func @transform_2(%arg0: i32) -> (i32, i32) {
    %c0_i32 = arith.constant 0 : i32
    %c0_i32_0 = arith.constant 0 : i32
    %c0_i32_1 = arith.constant 0 : i32
    return %c0_i32, %c0_i32_0 : i32, i32
  }
  func.func @transform_3(%arg0: i32) -> (i32, i32) {
    %c0_i32 = arith.constant 0 : i32
    %c0_i32_0 = arith.constant 0 : i32
    return %arg0, %c0_i32 : i32, i32
  }
}

</mosaic_0001>

<bundles_post_ra>
// kernel: basic_conv2d.3
= control target key start
LH: loop header
LB: loop body
LE: loop exit
PB: predicated region body
PF: predicated region fallthrough
CT: control target
= control target key end

     0   :  { %s896_s0 = inlined_call_operand.vmem [shape: f32[512,128], index: 0, kind: input, shape index: {}]   ;;  %s897_s1 = inlined_call_operand.vmem [shape: f32[1,128], index: 1, kind: input, shape index: {}]   ;;  %s898_s2 = inlined_call_operand.vmem [shape: f32[1,128], index: 2, kind: input, shape index: {}]   ;;  %s899_s3 = inlined_call_operand.vmem [shape: f32[512,128], index: 3, kind: output, shape index: {}]  }
   0x1   :  { %v14_v0 = vld [vmem:[%s896_s0] sm:$0xff]  ;;  %v15_v4 = vld [vmem:[%s896_s0 + $0x8] sm:$0xff]  ;;  %v16_v5 = vld [vmem:[%s896_s0 + $0x10] sm:$0xff] }
   0x2   :  { %v380_v1 = vld [vmem:[%s897_s1] ss:$0 sm:$0xff]  ;;  %v17_v6 = vld [vmem:[%s896_s0 + $0x18] sm:$0xff]  ;;  %v19_v11 = vld [vmem:[%s896_s0 + $0x28] sm:$0xff] }
   0x3   :  { %v385_v2 = vld [vmem:[%s898_s2] ss:$0 sm:$0xff]  ;;  %v85_v3 = vmul.f32 %v380_v1, %v14_v0  ;;  %v86_v7 = vmul.f32 %v380_v1, %v15_v4  ;;  %v87_v8 = vmul.f32 %v380_v1, %v16_v5  ;;  %v88_v9 = vmul.f32 %v380_v1, %v17_v6  ;;  %v20_v12 = vld [vmem:[%s896_s0 + $0x30] sm:$0xff]  ;;  %v21_v17 = vld [vmem:[%s896_s0 + $0x38] sm:$0xff] }
   0x4   :  { %v18_v10 = vld [vmem:[%s896_s0 + $0x20] sm:$0xff]  ;;  %v90_v15 = vmul.f32 %v380_v1, %v19_v11  ;;  %v91_v16 = vmul.f32 %v380_v1, %v20_v12  ;;  %v92_v21 = vmul.f32 %v380_v1, %v21_v17  ;;  %v23_v27 = vld [vmem:[%s896_s0 + $0x48] sm:$0xff]  ;;  %v24_v28 = vld [vmem:[%s896_s0 + $0x50] sm:$0xff] }
   0x5   :  { %v156_v13 = vadd.f32 %v385_v2, %v85_v3  ;;  %v89_v14 = vmul.f32 %v380_v1, %v18_v10  ;;  %v157_v18 = vadd.f32 %v385_v2, %v86_v7  ;;  %v158_v19 = vadd.f32 %v385_v2, %v87_v8  ;;  %v22_v22 = vld [vmem:[%s896_s0 + $0x40] sm:$0xff]  ;;  %v25_v29 = vld [vmem:[%s896_s0 + $0x58] sm:$0xff]  ;;  %v27_v35 = vld [vmem:[%s896_s0 + $0x68] sm:$0xff] }
   0x6   :  { %v159_v20 = vadd.f32 %v385_v2, %v88_v9  ;;  %v161_v25 = vadd.f32 %v385_v2, %v90_v15  ;;  %v162_v26 = vadd.f32 %v385_v2, %v91_v16  ;;  %v163_v33 = vadd.f32 %v385_v2, %v92_v21  ;;  %v26_v34 = vld [vmem:[%s896_s0 + $0x60] sm:$0xff]  ;;  %v28_v36 = vld [vmem:[%s896_s0 + $0x70] sm:$0xff]  ;;  %v29_v41 = vld [vmem:[%s896_s0 + $0x78] sm:$0xff] }
   0x7   :  { %v220_v23 = vmax.f32 %v156_v13, 0.0  ;;  %v160_v24 = vadd.f32 %v385_v2, %v89_v14  ;;  %v221_v30 = vmax.f32 %v157_v18, 0.0  ;;  %v222_v31 = vmax.f32 %v158_v19, 0.0  ;;  %v30_v54 = vld [vmem:[%s896_s0 + $0x80] sm:$0xff]  ;;  %v31_v59 = vld [vmem:[%s896_s0 + $0x88] sm:$0xff]  ;;  %v32_v60 = vld [vmem:[%s896_s0 + $0x90] sm:$0xff] }
   0x8   :  { %v223_v32 = vmax.f32 %v159_v20, 0.0  ;;  %v225_v38 = vmax.f32 %v161_v25, 0.0  ;;  %v226_v39 = vmax.f32 %v162_v26, 0.0  ;;  %v93_v40 = vmul.f32 %v380_v1, %v22_v22  ;;  %v33_v61 = vld [vmem:[%s896_s0 + $0x98] sm:$0xff]  ;;  %v34_v4 = vld [vmem:[%s896_s0 + $0xa0] sm:$0xff]  ;;  %v35_v5 = vld [vmem:[%s896_s0 + $0xa8] sm:$0xff] }
   0x9   :  { %284 = vst [vmem:[%s899_s3] sm:$0xff] %v220_v23  ;;  %v224_v37 = vmax.f32 %v160_v24, 0.0  ;;  %285 = vst [vmem:[%s899_s3 + $0x8] sm:$0xff] %v221_v30  ;;  %v227_v42 = vmax.f32 %v163_v33, 0.0  ;;  %v94_v43 = vmul.f32 %v380_v1, %v23_v27  ;;  %v95_v44 = vmul.f32 %v380_v1, %v24_v28  ;;  %v36_v6 = vld [vmem:[%s896_s0 + $0xb0] sm:$0xff]  ;;  %v37_v11 = vld [vmem:[%s896_s0 + $0xb8] sm:$0xff] }
   0xa   :  { %286 = vst [vmem:[%s899_s3 + $0x10] sm:$0xff] %v222_v31  ;;  %287 = vst [vmem:[%s899_s3 + $0x18] sm:$0xff] %v223_v32  ;;  %v96_v45 = vmul.f32 %v380_v1, %v25_v29  ;;  %v164_v46 = vadd.f32 %v385_v2, %v93_v40  ;;  %v97_v47 = vmul.f32 %v380_v1, %v26_v34  ;;  %v38_v24 = vld [vmem:[%s896_s0 + $0xc0] sm:$0xff]  ;;  %v39_v29 = vld [vmem:[%s896_s0 + $0xc8] sm:$0xff] }
   0xb   :  { %288 = vst [vmem:[%s899_s3 + $0x20] sm:$0xff] %v224_v37  ;;  %289 = vst [vmem:[%s899_s3 + $0x28] sm:$0xff] %v225_v38  ;;  %v98_v48 = vmul.f32 %v380_v1, %v27_v35  ;;  %v99_v49 = vmul.f32 %v380_v1, %v28_v36  ;;  %v165_v50 = vadd.f32 %v385_v2, %v94_v43  ;;  %v40_v30 = vld [vmem:[%s896_s0 + $0xd0] sm:$0xff]  ;;  %v41_v31 = vld [vmem:[%s896_s0 + $0xd8] sm:$0xff] }
   0xc   :  { %290 = vst [vmem:[%s899_s3 + $0x30] sm:$0xff] %v226_v39  ;;  %291 = vst [vmem:[%s899_s3 + $0x38] sm:$0xff] %v227_v42  ;;  %v166_v51 = vadd.f32 %v385_v2, %v95_v44  ;;  %v167_v52 = vadd.f32 %v385_v2, %v96_v45  ;;  %v100_v53 = vmul.f32 %v380_v1, %v29_v41  ;;  %v228_v55 = vmax.f32 %v164_v46, 0.0  ;;  %v42_v36 = vld [vmem:[%s896_s0 + $0xe0] sm:$0xff]  ;;  %v43_v37 = vld [vmem:[%s896_s0 + $0xe8] sm:$0xff] }
   0xd   :  { %v168_v56 = vadd.f32 %v385_v2, %v97_v47  ;;  %v169_v57 = vadd.f32 %v385_v2, %v98_v48  ;;  %v170_v58 = vadd.f32 %v385_v2, %v99_v49  ;;  %v229_v62 = vmax.f32 %v165_v50, 0.0  ;;  %v44_v38 = vld [vmem:[%s896_s0 + $0xf0] sm:$0xff]  ;;  %v45_v43 = vld [vmem:[%s896_s0 + $0xf8] sm:$0xff] }
   0xe   :  { %v230_v63 = vmax.f32 %v166_v51, 0.0  ;;  %v231_v0 = vmax.f32 %v167_v52, 0.0  ;;  %v171_v3 = vadd.f32 %v385_v2, %v100_v53  ;;  %292 = vst [vmem:[%s899_s3 + $0x40] sm:$0xff] %v228_v55  ;;  %v101_v10 = vmul.f32 %v380_v1, %v30_v54 }
   0xf   :  { %v232_v7 = vmax.f32 %v168_v56, 0.0  ;;  %v233_v8 = vmax.f32 %v169_v57, 0.0  ;;  %v234_v9 = vmax.f32 %v170_v58, 0.0  ;;  %293 = vst [vmem:[%s899_s3 + $0x48] sm:$0xff] %v229_v62  ;;  %v102_v13 = vmul.f32 %v380_v1, %v31_v59  ;;  %v46_v56 = vld [vmem:[%s896_s0 + $0x100] sm:$0xff]  ;;  %v48_v62 = vld [vmem:[%s896_s0 + $0x110] sm:$0xff] }
  0x10   :  { %294 = vst [vmem:[%s899_s3 + $0x50] sm:$0xff] %v230_v63  ;;  %295 = vst [vmem:[%s899_s3 + $0x58] sm:$0xff] %v231_v0  ;;  %v235_v12 = vmax.f32 %v171_v3, 0.0  ;;  %v103_v14 = vmul.f32 %v380_v1, %v32_v60  ;;  %v104_v15 = vmul.f32 %v380_v1, %v33_v61  ;;  %v172_v16 = vadd.f32 %v385_v2, %v101_v10  ;;  %v47_v61 = vld [vmem:[%s896_s0 + $0x108] sm:$0xff]  ;;  %v49_v63 = vld [vmem:[%s896_s0 + $0x118] sm:$0xff] }
  0x11   :  { %296 = vst [vmem:[%s899_s3 + $0x60] sm:$0xff] %v232_v7  ;;  %297 = vst [vmem:[%s899_s3 + $0x68] sm:$0xff] %v233_v8  ;;  %v105_v17 = vmul.f32 %v380_v1, %v34_v4  ;;  %v106_v18 = vmul.f32 %v380_v1, %v35_v5  ;;  %v107_v19 = vmul.f32 %v380_v1, %v36_v6  ;;  %v50_v6 = vld [vmem:[%s896_s0 + $0x120] sm:$0xff]  ;;  %v51_v7 = vld [vmem:[%s896_s0 + $0x128] sm:$0xff] }
  0x12   :  { %298 = vst [vmem:[%s899_s3 + $0x70] sm:$0xff] %v234_v9  ;;  %299 = vst [vmem:[%s899_s3 + $0x78] sm:$0xff] %v235_v12  ;;  %v173_v20 = vadd.f32 %v385_v2, %v102_v13  ;;  %v174_v21 = vadd.f32 %v385_v2, %v103_v14  ;;  %v175_v22 = vadd.f32 %v385_v2, %v104_v15  ;;  %v236_v25 = vmax.f32 %v172_v16, 0.0  ;;  %v52_v8 = vld [vmem:[%s896_s0 + $0x130] sm:$0xff]  ;;  %v53_v13 = vld [vmem:[%s896_s0 + $0x138] sm:$0xff] }
  0x13   :  { %v108_v23 = vmul.f32 %v380_v1, %v37_v11  ;;  %v176_v26 = vadd.f32 %v385_v2, %v105_v17  ;;  %v177_v27 = vadd.f32 %v385_v2, %v106_v18  ;;  %v178_v28 = vadd.f32 %v385_v2, %v107_v19 }
  0x14   :  { %v237_v32 = vmax.f32 %v173_v20, 0.0  ;;  %v238_v33 = vmax.f32 %v174_v21, 0.0  ;;  %v239_v34 = vmax.f32 %v175_v22, 0.0  ;;  %300 = vst [vmem:[%s899_s3 + $0x80] sm:$0xff] %v236_v25  ;;  %v109_v42 = vmul.f32 %v380_v1, %v38_v24 }
  0x15   :  { %v179_v35 = vadd.f32 %v385_v2, %v108_v23  ;;  %v240_v39 = vmax.f32 %v176_v26, 0.0  ;;  %v241_v40 = vmax.f32 %v177_v27, 0.0  ;;  %v242_v41 = vmax.f32 %v178_v28, 0.0  ;;  %v54_v26 = vld [vmem:[%s896_s0 + $0x140] sm:$0xff] }
  0x16   :  { %301 = vst [vmem:[%s899_s3 + $0x88] sm:$0xff] %v237_v32  ;;  %302 = vst [vmem:[%s899_s3 + $0x90] sm:$0xff] %v238_v33  ;;  %v110_v45 = vmul.f32 %v380_v1, %v39_v29  ;;  %v111_v46 = vmul.f32 %v380_v1, %v40_v30  ;;  %v112_v47 = vmul.f32 %v380_v1, %v41_v31  ;;  %v55_v31 = vld [vmem:[%s896_s0 + $0x148] sm:$0xff]  ;;  %v56_v32 = vld [vmem:[%s896_s0 + $0x150] sm:$0xff] }
  0x17   :  { %303 = vst [vmem:[%s899_s3 + $0x98] sm:$0xff] %v239_v34  ;;  %v243_v44 = vmax.f32 %v179_v35, 0.0  ;;  %304 = vst [vmem:[%s899_s3 + $0xa0] sm:$0xff] %v240_v39  ;;  %v180_v48 = vadd.f32 %v385_v2, %v109_v42  ;;  %v113_v49 = vmul.f32 %v380_v1, %v42_v36  ;;  %v114_v50 = vmul.f32 %v380_v1, %v43_v37  ;;  %v57_v33 = vld [vmem:[%s896_s0 + $0x158] sm:$0xff]  ;;  %v59_v39 = vld [vmem:[%s896_s0 + $0x168] sm:$0xff] }
  0x18   :  { %305 = vst [vmem:[%s899_s3 + $0xa8] sm:$0xff] %v241_v40  ;;  %306 = vst [vmem:[%s899_s3 + $0xb0] sm:$0xff] %v242_v41  ;;  %v115_v51 = vmul.f32 %v380_v1, %v44_v38  ;;  %v181_v52 = vadd.f32 %v385_v2, %v110_v45  ;;  %v182_v53 = vadd.f32 %v385_v2, %v111_v46  ;;  %v58_v38 = vld [vmem:[%s896_s0 + $0x160] sm:$0xff]  ;;  %v60_v40 = vld [vmem:[%s896_s0 + $0x170] sm:$0xff] }
  0x19   :  { %307 = vst [vmem:[%s899_s3 + $0xb8] sm:$0xff] %v243_v44  ;;  %v183_v54 = vadd.f32 %v385_v2, %v112_v47  ;;  %v116_v55 = vmul.f32 %v380_v1, %v45_v43  ;;  %v244_v57 = vmax.f32 %v180_v48, 0.0  ;;  %v184_v58 = vadd.f32 %v385_v2, %v113_v49  ;;  %v61_v45 = vld [vmem:[%s896_s0 + $0x178] sm:$0xff] }
  0x1a   :  { %v185_v59 = vadd.f32 %v385_v2, %v114_v50  ;;  %v186_v60 = vadd.f32 %v385_v2, %v115_v51  ;;  %v245_v0 = vmax.f32 %v181_v52, 0.0  ;;  %v246_v3 = vmax.f32 %v182_v53, 0.0 }
  0x1b   :  { %v247_v4 = vmax.f32 %v183_v54, 0.0  ;;  %v187_v5 = vadd.f32 %v385_v2, %v116_v55  ;;  %308 = vst [vmem:[%s899_s3 + $0xc0] sm:$0xff] %v244_v57  ;;  %v248_v9 = vmax.f32 %v184_v58, 0.0  ;;  %v117_v12 = vmul.f32 %v380_v1, %v46_v56  ;;  %v62_v58 = vld [vmem:[%s896_s0 + $0x180] sm:$0xff] }
  0x1c   :  { %v249_v10 = vmax.f32 %v185_v59, 0.0  ;;  %v250_v11 = vmax.f32 %v186_v60, 0.0  ;;  %309 = vst [vmem:[%s899_s3 + $0xc8] sm:$0xff] %v245_v0  ;;  %310 = vst [vmem:[%s899_s3 + $0xd0] sm:$0xff] %v246_v3  ;;  %v118_v15 = vmul.f32 %v380_v1, %v47_v61  ;;  %v119_v16 = vmul.f32 %v380_v1, %v48_v62  ;;  %v64_v0 = vld [vmem:[%s896_s0 + $0x190] sm:$0xff]  ;;  %v65_v3 = vld [vmem:[%s896_s0 + $0x198] sm:$0xff] }
  0x1d   :  { %311 = vst [vmem:[%s899_s3 + $0xd8] sm:$0xff] %v247_v4  ;;  %v251_v14 = vmax.f32 %v187_v5, 0.0  ;;  %v120_v17 = vmul.f32 %v380_v1, %v49_v63  ;;  %312 = vst [vmem:[%s899_s3 + $0xe0] sm:$0xff] %v248_v9  ;;  %v188_v18 = vadd.f32 %v385_v2, %v117_v12  ;;  %v121_v19 = vmul.f32 %v380_v1, %v50_v6  ;;  %v63_v63 = vld [vmem:[%s896_s0 + $0x188] sm:$0xff] }
  0x1e   :  { %313 = vst [vmem:[%s899_s3 + $0xe8] sm:$0xff] %v249_v10  ;;  %314 = vst [vmem:[%s899_s3 + $0xf0] sm:$0xff] %v250_v11  ;;  %v122_v20 = vmul.f32 %v380_v1, %v51_v7  ;;  %v123_v21 = vmul.f32 %v380_v1, %v52_v8  ;;  %v189_v22 = vadd.f32 %v385_v2, %v118_v15  ;;  %v66_v8 = vld [vmem:[%s896_s0 + $0x1a0] sm:$0xff]  ;;  %v67_v9 = vld [vmem:[%s896_s0 + $0x1a8] sm:$0xff] }
  0x1f   :  { %315 = vst [vmem:[%s899_s3 + $0xf8] sm:$0xff] %v251_v14  ;;  %v190_v23 = vadd.f32 %v385_v2, %v119_v16  ;;  %v191_v24 = vadd.f32 %v385_v2, %v120_v17  ;;  %v124_v25 = vmul.f32 %v380_v1, %v53_v13  ;;  %v252_v27 = vmax.f32 %v188_v18, 0.0  ;;  %v68_v10 = vld [vmem:[%s896_s0 + $0x1b0] sm:$0xff]  ;;  %v69_v15 = vld [vmem:[%s896_s0 + $0x1b8] sm:$0xff] }
  0x20   :  { %v192_v28 = vadd.f32 %v385_v2, %v121_v19  ;;  %v193_v29 = vadd.f32 %v385_v2, %v122_v20  ;;  %v194_v30 = vadd.f32 %v385_v2, %v123_v21  ;;  %v253_v34 = vmax.f32 %v189_v22, 0.0 }
  0x21   :  { %v254_v35 = vmax.f32 %v190_v23, 0.0  ;;  %v255_v36 = vmax.f32 %v191_v24, 0.0  ;;  %v195_v37 = vadd.f32 %v385_v2, %v124_v25  ;;  %316 = vst [vmem:[%s899_s3 + $0x100] sm:$0xff] %v252_v27  ;;  %v125_v44 = vmul.f32 %v380_v1, %v54_v26 }
  0x22   :  { %v256_v41 = vmax.f32 %v192_v28, 0.0  ;;  %v257_v42 = vmax.f32 %v193_v29, 0.0  ;;  %v258_v43 = vmax.f32 %v194_v30, 0.0  ;;  %317 = vst [vmem:[%s899_s3 + $0x108] sm:$0xff] %v253_v34  ;;  %v126_v47 = vmul.f32 %v380_v1, %v55_v31  ;;  %v70_v28 = vld [vmem:[%s896_s0 + $0x1c0] sm:$0xff]  ;;  %v72_v34 = vld [vmem:[%s896_s0 + $0x1d0] sm:$0xff] }
  0x23   :  { %318 = vst [vmem:[%s899_s3 + $0x110] sm:$0xff] %v254_v35  ;;  %319 = vst [vmem:[%s899_s3 + $0x118] sm:$0xff] %v255_v36  ;;  %v259_v46 = vmax.f32 %v195_v37, 0.0  ;;  %v127_v48 = vmul.f32 %v380_v1, %v56_v32  ;;  %v128_v49 = vmul.f32 %v380_v1, %v57_v33  ;;  %v196_v50 = vadd.f32 %v385_v2, %v125_v44  ;;  %v71_v33 = vld [vmem:[%s896_s0 + $0x1c8] sm:$0xff]  ;;  %v73_v35 = vld [vmem:[%s896_s0 + $0x1d8] sm:$0xff] }
  0x24   :  { %320 = vst [vmem:[%s899_s3 + $0x120] sm:$0xff] %v256_v41  ;;  %321 = vst [vmem:[%s899_s3 + $0x128] sm:$0xff] %v257_v42  ;;  %v129_v51 = vmul.f32 %v380_v1, %v58_v38  ;;  %v130_v52 = vmul.f32 %v380_v1, %v59_v39  ;;  %v131_v53 = vmul.f32 %v380_v1, %v60_v40  ;;  %v74_v40 = vld [vmem:[%s896_s0 + $0x1e0] sm:$0xff]  ;;  %v75_v41 = vld [vmem:[%s896_s0 + $0x1e8] sm:$0xff] }
  0x25   :  { %322 = vst [vmem:[%s899_s3 + $0x130] sm:$0xff] %v258_v43  ;;  %323 = vst [vmem:[%s899_s3 + $0x138] sm:$0xff] %v259_v46  ;;  %v197_v54 = vadd.f32 %v385_v2, %v126_v47  ;;  %v198_v55 = vadd.f32 %v385_v2, %v127_v48  ;;  %v199_v56 = vadd.f32 %v385_v2, %v128_v49  ;;  %v260_v59 = vmax.f32 %v196_v50, 0.0  ;;  %v76_v42 = vld [vmem:[%s896_s0 + $0x1f0] sm:$0xff]  ;;  %v77_v47 = vld [vmem:[%s896_s0 + $0x1f8] sm:$0xff] }
  0x26   :  { %v132_v57 = vmul.f32 %v380_v1, %v61_v45  ;;  %v200_v60 = vadd.f32 %v385_v2, %v129_v51  ;;  %v201_v61 = vadd.f32 %v385_v2, %v130_v52  ;;  %v202_v62 = vadd.f32 %v385_v2, %v131_v53 }
  0x27   :  { %v261_v4 = vmax.f32 %v197_v54, 0.0  ;;  %v262_v5 = vmax.f32 %v198_v55, 0.0  ;;  %v263_v6 = vmax.f32 %v199_v56, 0.0  ;;  %324 = vst [vmem:[%s899_s3 + $0x140] sm:$0xff] %v260_v59  ;;  %v133_v14 = vmul.f32 %v380_v1, %v62_v58 }
  0x28   :  { %v203_v7 = vadd.f32 %v385_v2, %v132_v57  ;;  %v264_v11 = vmax.f32 %v200_v60, 0.0  ;;  %v265_v12 = vmax.f32 %v201_v61, 0.0  ;;  %v266_v13 = vmax.f32 %v202_v62, 0.0 }
  0x29   :  { %325 = vst [vmem:[%s899_s3 + $0x148] sm:$0xff] %v261_v4  ;;  %326 = vst [vmem:[%s899_s3 + $0x150] sm:$0xff] %v262_v5  ;;  %v134_v17 = vmul.f32 %v380_v1, %v63_v63  ;;  %v135_v18 = vmul.f32 %v380_v1, %v64_v0  ;;  %v136_v19 = vmul.f32 %v380_v1, %v65_v3 }
  0x2a   :  { %327 = vst [vmem:[%s899_s3 + $0x158] sm:$0xff] %v263_v6  ;;  %v267_v16 = vmax.f32 %v203_v7, 0.0  ;;  %328 = vst [vmem:[%s899_s3 + $0x160] sm:$0xff] %v264_v11  ;;  %v204_v20 = vadd.f32 %v385_v2, %v133_v14  ;;  %v137_v21 = vmul.f32 %v380_v1, %v66_v8  ;;  %v138_v22 = vmul.f32 %v380_v1, %v67_v9 }
  0x2b   :  { %329 = vst [vmem:[%s899_s3 + $0x168] sm:$0xff] %v265_v12  ;;  %330 = vst [vmem:[%s899_s3 + $0x170] sm:$0xff] %v266_v13  ;;  %v139_v23 = vmul.f32 %v380_v1, %v68_v10  ;;  %v205_v24 = vadd.f32 %v385_v2, %v134_v17  ;;  %v206_v25 = vadd.f32 %v385_v2, %v135_v18 }
  0x2c   :  { %331 = vst [vmem:[%s899_s3 + $0x178] sm:$0xff] %v267_v16  ;;  %v207_v26 = vadd.f32 %v385_v2, %v136_v19  ;;  %v140_v27 = vmul.f32 %v380_v1, %v69_v15  ;;  %v268_v29 = vmax.f32 %v204_v20, 0.0  ;;  %v208_v30 = vadd.f32 %v385_v2, %v137_v21 }
  0x2d   :  { %v209_v31 = vadd.f32 %v385_v2, %v138_v22  ;;  %v210_v32 = vadd.f32 %v385_v2, %v139_v23  ;;  %v269_v36 = vmax.f32 %v205_v24, 0.0  ;;  %v270_v37 = vmax.f32 %v206_v25, 0.0 }
  0x2e   :  { %v271_v38 = vmax.f32 %v207_v26, 0.0  ;;  %v211_v39 = vadd.f32 %v385_v2, %v140_v27  ;;  %332 = vst [vmem:[%s899_s3 + $0x180] sm:$0xff] %v268_v29  ;;  %v272_v43 = vmax.f32 %v208_v30, 0.0  ;;  %v141_v46 = vmul.f32 %v380_v1, %v70_v28 }
  0x2f   :  { %v273_v44 = vmax.f32 %v209_v31, 0.0  ;;  %v274_v45 = vmax.f32 %v210_v32, 0.0  ;;  %333 = vst [vmem:[%s899_s3 + $0x188] sm:$0xff] %v269_v36  ;;  %334 = vst [vmem:[%s899_s3 + $0x190] sm:$0xff] %v270_v37  ;;  %v142_v49 = vmul.f32 %v380_v1, %v71_v33  ;;  %v143_v50 = vmul.f32 %v380_v1, %v72_v34 }
  0x30   :  { %335 = vst [vmem:[%s899_s3 + $0x198] sm:$0xff] %v271_v38  ;;  %v275_v48 = vmax.f32 %v211_v39, 0.0  ;;  %v144_v51 = vmul.f32 %v380_v1, %v73_v35  ;;  %336 = vst [vmem:[%s899_s3 + $0x1a0] sm:$0xff] %v272_v43  ;;  %v212_v52 = vadd.f32 %v385_v2, %v141_v46  ;;  %v145_v53 = vmul.f32 %v380_v1, %v74_v40 }
  0x31   :  { %337 = vst [vmem:[%s899_s3 + $0x1a8] sm:$0xff] %v273_v44  ;;  %338 = vst [vmem:[%s899_s3 + $0x1b0] sm:$0xff] %v274_v45  ;;  %v146_v54 = vmul.f32 %v380_v1, %v75_v41  ;;  %v147_v55 = vmul.f32 %v380_v1, %v76_v42  ;;  %v213_v56 = vadd.f32 %v385_v2, %v142_v49 }
  0x32   :  { %339 = vst [vmem:[%s899_s3 + $0x1b8] sm:$0xff] %v275_v48  ;;  %v214_v57 = vadd.f32 %v385_v2, %v143_v50  ;;  %v215_v58 = vadd.f32 %v385_v2, %v144_v51  ;;  %v148_v59 = vmul.f32 %v380_v1, %v77_v47  ;;  %v276_v60 = vmax.f32 %v212_v52, 0.0 }
  0x33   :  { %v216_v61 = vadd.f32 %v385_v2, %v145_v53  ;;  %v217_v62 = vadd.f32 %v385_v2, %v146_v54  ;;  %v218_v63 = vadd.f32 %v385_v2, %v147_v55  ;;  %v277_v0 = vmax.f32 %v213_v56, 0.0 }
  0x34   :  { %v278_v3 = vmax.f32 %v214_v57, 0.0  ;;  %v279_v4 = vmax.f32 %v215_v58, 0.0  ;;  %v219_v5 = vadd.f32 %v385_v2, %v148_v59  ;;  %340 = vst [vmem:[%s899_s3 + $0x1c0] sm:$0xff] %v276_v60 }
  0x35   :  { %v280_v6 = vmax.f32 %v216_v61, 0.0  ;;  %v281_v7 = vmax.f32 %v217_v62, 0.0  ;;  %v282_v8 = vmax.f32 %v218_v63, 0.0  ;;  %341 = vst [vmem:[%s899_s3 + $0x1c8] sm:$0xff] %v277_v0 }
  0x36   :  { %342 = vst [vmem:[%s899_s3 + $0x1d0] sm:$0xff] %v278_v3  ;;  %343 = vst [vmem:[%s899_s3 + $0x1d8] sm:$0xff] %v279_v4  ;;  %v283_v1 = vmax.f32 %v219_v5, 0.0 }
  0x37   :  { %344 = vst [vmem:[%s899_s3 + $0x1e0] sm:$0xff] %v280_v6  ;;  %345 = vst [vmem:[%s899_s3 + $0x1e8] sm:$0xff] %v281_v7 }
  0x38   :  { %346 = vst [vmem:[%s899_s3 + $0x1f0] sm:$0xff] %v282_v8  ;;  %347 = vst [vmem:[%s899_s3 + $0x1f8] sm:$0xff] %v283_v1 }

// kernel: basic_conv2d.2
= control target key start
LH: loop header
LB: loop body
LE: loop exit
PB: predicated region body
PF: predicated region fallthrough
CT: control target
= control target key end

     0   :  { %vm215_vm0 = vcmask 293888   ;;  %vm408_vm1 = vcmask 1043456   ;;  %s2200_s1 = inlined_call_operand.vmem [shape: f32[36,128], index: 1, kind: input, shape index: {}]   ;;  %s2201_s0 = inlined_call_operand.vmem [shape: f32[512,36], index: 0, kind: input, shape index: {}]   ;;  %s2202_s2 = inlined_call_operand.vmem [shape: f32[512,128], index: 2, kind: output, shape index: {0}]   ;;  %s2203_s3 = inlined_call_operand.vmem [shape: f32[8,128], index: 3, kind: output, shape index: {1}]   ;;  %s2204_s4 = inlined_call_operand.vmem [shape: f32[8,128], index: 4, kind: output, shape index: {2}]  }
   0x1   :  { %v210_v0 = vld [vmem:[%s2200_s1] sm:$0xff]  ;;  %v211_v1 = vld [vmem:[%s2200_s1 + $0x8] sm:$0xff]  ;;  %v212_v2 = vld [vmem:[%s2200_s1 + $0x10] sm:$0xff] }
   0x2   :  { %v1500_v3 = vpack.c.bf16 %v211_v1, %v210_v0  ;;  %v213_v4 = vld [vmem:[%s2200_s1 + $0x18] sm:$0xff]  ;;  %v146_v5 = vld [vmem:[%s2201_s0] sm:$0xff]  ;;  %v147_v8 = vld [vmem:[%s2201_s0 + $0x8] sm:$0xff] }
   0x3   :  { %v1504_v6 = vpack.c.bf16 %v213_v4, %v212_v2  ;;  %1404 = vmatprep.mubr.msk.f32.mxu0 %vm215_vm0, %v146_v5  ;;  %v214_v7 = vld [vmem:[%s2200_s1 + $0x20] sm:$0xf]  ;;  %v148_v9 = vld [vmem:[%s2201_s0 + $0x10] sm:$0xff]  ;;  %v179_v11 = vld [vmem:[%s2201_s0 + $0x108] sm:$0xff] }
   0x4   :  { %1501 = vmatprep.subr.bf16.mxu0 %v1500_v3  ;;  %1508 = vmatprep.subr.bf16.mxu1 %v1500_v3  ;;  %v178_v10 = vld [vmem:[%s2201_s0 + $0x100] sm:$0xff]  ;;  %v180_v12 = vld [vmem:[%s2201_s0 + $0x110] sm:$0xff]  ;;  %v149_v13 = vld [vmem:[%s2201_s0 + $0x18] sm:$0xff] }
   0x5   :  { %1503 = vmatpush3.bf16.msra.mxu0 %v1500_v3  ;;  %1511 = vmatpush3.bf16.msra.mxu1 %v1500_v3  ;;  %v150_v14 = vld [vmem:[%s2201_s0 + $0x20] sm:$0xff]  ;;  %v181_v15 = vld [vmem:[%s2201_s0 + $0x118] sm:$0xff]  ;;  %v151_v17 = vld [vmem:[%s2201_s0 + $0x28] sm:$0xff] }
   0x6   :  { %1505 = vmatprep.subr.bf16.mxu0 %v1504_v6  ;;  %1509 = vmatprep.subr.bf16.mxu1 %v1504_v6  ;;  %v182_v16 = vld [vmem:[%s2201_s0 + $0x120] sm:$0xff]  ;;  %v152_v18 = vld [vmem:[%s2201_s0 + $0x30] sm:$0xff]  ;;  %v183_v19 = vld [vmem:[%s2201_s0 + $0x128] sm:$0xff] }
   0x7   :  { %1452 = vmatprep.mubr.msk.f32.mxu1 %vm215_vm0, %v178_v10  ;;  %v184_v20 = vld [vmem:[%s2201_s0 + $0x130] sm:$0xff]  ;;  %v153_v21 = vld [vmem:[%s2201_s0 + $0x38] sm:$0xff]  ;;  %v154_v22 = vld [vmem:[%s2201_s0 + $0x40] sm:$0xff] }
   0x8   :  { %v185_v23 = vld [vmem:[%s2201_s0 + $0x138] sm:$0xff]  ;;  %v186_v24 = vld [vmem:[%s2201_s0 + $0x140] sm:$0xff]  ;;  %v155_v25 = vld [vmem:[%s2201_s0 + $0x48] sm:$0xff] }
   0x9   :  { %1507 = vmatpush3.bf16.msra.mxu0 %v1504_v6  ;;  %1512 = vmatpush3.bf16.msra.mxu1 %v1504_v6  ;;  %v156_v26 = vld [vmem:[%s2201_s0 + $0x50] sm:$0xff]  ;;  %v187_v27 = vld [vmem:[%s2201_s0 + $0x148] sm:$0xff]  ;;  %v157_v29 = vld [vmem:[%s2201_s0 + $0x58] sm:$0xff] }
   0xa   :  { %1402 = vmatprep.subr.msk.mxu0 %vm408_vm1, %v214_v7  ;;  %1510 = vmatprep.subr.msk.mxu1 %vm408_vm1, %v214_v7  ;;  %v188_v28 = vld [vmem:[%s2201_s0 + $0x150] sm:$0xff]  ;;  %v158_v30 = vld [vmem:[%s2201_s0 + $0x60] sm:$0xff]  ;;  %v189_v31 = vld [vmem:[%s2201_s0 + $0x158] sm:$0xff] }
   0xb   :  { %v190_v32 = vld [vmem:[%s2201_s0 + $0x160] sm:$0xff]  ;;  %v159_v33 = vld [vmem:[%s2201_s0 + $0x68] sm:$0xff]  ;;  %v160_v34 = vld [vmem:[%s2201_s0 + $0x70] sm:$0xff] }
   0xc   :  { %v191_v35 = vld [vmem:[%s2201_s0 + $0x168] sm:$0xff]  ;;  %v192_v36 = vld [vmem:[%s2201_s0 + $0x170] sm:$0xff]  ;;  %v161_v37 = vld [vmem:[%s2201_s0 + $0x78] sm:$0xff] }
   0xd   :  { %1403 = vmatpush3.msk.msra.mxu0 %vm408_vm1, %v214_v7  ;;  %1513 = vmatpush3.msk.msra.mxu1 %vm408_vm1, %v214_v7  ;;  %v162_v38 = vld [vmem:[%s2201_s0 + $0x80] sm:$0xff]  ;;  %v193_v39 = vld [vmem:[%s2201_s0 + $0x178] sm:$0xff]  ;;  %v163_v41 = vld [vmem:[%s2201_s0 + $0x88] sm:$0xff] }
   0xe   :  { %1405 = vmatmul.mubr.msk.f32.vlgmr.msra.gmra.mrb[0].mxu0 %vm215_vm0, %v147_v8  ;;  %1453 = vmatmul.mubr.msk.f32.vlgmr.msra.gmra.mrb[0].mxu1 %vm215_vm0, %v179_v11  ;;  %v194_v40 = vld [vmem:[%s2201_s0 + $0x180] sm:$0xff]  ;;  %v164_v42 = vld [vmem:[%s2201_s0 + $0x90] sm:$0xff]  ;;  %v195_v43 = vld [vmem:[%s2201_s0 + $0x188] sm:$0xff] }
   0xf   :  { %1407 = vmatprep.mubr.msk.f32.mxu0 %vm215_vm0, %v148_v9  ;;  %1455 = vmatprep.mubr.msk.f32.mxu1 %vm215_vm0, %v180_v12  ;;  %v196_v44 = vld [vmem:[%s2201_s0 + $0x190] sm:$0xff]  ;;  %v165_v45 = vld [vmem:[%s2201_s0 + $0x98] sm:$0xff]  ;;  %v166_v46 = vld [vmem:[%s2201_s0 + $0xa0] sm:$0xff] }
  0x10   :  { %v197_v47 = vld [vmem:[%s2201_s0 + $0x198] sm:$0xff]  ;;  %v198_v48 = vld [vmem:[%s2201_s0 + $0x1a0] sm:$0xff]  ;;  %v167_v49 = vld [vmem:[%s2201_s0 + $0xa8] sm:$0xff] }
  0x11   :  { %v168_v50 = vld [vmem:[%s2201_s0 + $0xb0] sm:$0xff]  ;;  %v199_v51 = vld [vmem:[%s2201_s0 + $0x1a8] sm:$0xff]  ;;  %v169_v53 = vld [vmem:[%s2201_s0 + $0xb8] sm:$0xff] }
  0x12   :  { %1408 = vmatmul.mubr.msk.f32.gmra.mrb[2].mxu0 %vm215_vm0, %v149_v13  ;;  %1456 = vmatmul.mubr.msk.f32.gmra.mrb[2].mxu1 %vm215_vm0, %v181_v15  ;;  %v200_v52 = vld [vmem:[%s2201_s0 + $0x1b0] sm:$0xff]  ;;  %v170_v54 = vld [vmem:[%s2201_s0 + $0xc0] sm:$0xff]  ;;  %v201_v55 = vld [vmem:[%s2201_s0 + $0x1b8] sm:$0xff] }
  0x13   :  { %1410 = vmatprep.mubr.msk.f32.mxu0 %vm215_vm0, %v150_v14  ;;  %1458 = vmatprep.mubr.msk.f32.mxu1 %vm215_vm0, %v182_v16  ;;  %v202_v56 = vld [vmem:[%s2201_s0 + $0x1c0] sm:$0xff]  ;;  %v171_v57 = vld [vmem:[%s2201_s0 + $0xc8] sm:$0xff]  ;;  %v172_v58 = vld [vmem:[%s2201_s0 + $0xd0] sm:$0xff] }
  0x14   :  { %v203_v59 = vld [vmem:[%s2201_s0 + $0x1c8] sm:$0xff]  ;;  %v204_v60 = vld [vmem:[%s2201_s0 + $0x1d0] sm:$0xff]  ;;  %v173_v61 = vld [vmem:[%s2201_s0 + $0xd8] sm:$0xff] }
  0x15   :  { %v174_v62 = vld [vmem:[%s2201_s0 + $0xe0] sm:$0xff]  ;;  %v205_v63 = vld [vmem:[%s2201_s0 + $0x1d8] sm:$0xff]  ;;  %v175_v1 = vld [vmem:[%s2201_s0 + $0xe8] sm:$0xff] }
  0x16   :  { %1411 = vmatmul.mubr.msk.f32.gmra.mrb[4].mxu0 %vm215_vm0, %v151_v17  ;;  %1459 = vmatmul.mubr.msk.f32.gmra.mrb[4].mxu1 %vm215_vm0, %v183_v19  ;;  %v206_v0 = vld [vmem:[%s2201_s0 + $0x1e0] sm:$0xff]  ;;  %v176_v2 = vld [vmem:[%s2201_s0 + $0xf0] sm:$0xff]  ;;  %v207_v3 = vld [vmem:[%s2201_s0 + $0x1e8] sm:$0xff] }
  0x17   :  { %1413 = vmatprep.mubr.msk.f32.mxu0 %vm215_vm0, %v152_v18  ;;  %1461 = vmatprep.mubr.msk.f32.mxu1 %vm215_vm0, %v184_v20  ;;  %v208_v4 = vld [vmem:[%s2201_s0 + $0x1f0] sm:$0xff]  ;;  %v177_v5 = vld [vmem:[%s2201_s0 + $0xf8] sm:$0xff] }
  0x18   :  { %v209_v6 = vld [vmem:[%s2201_s0 + $0x1f8] sm:$0xff] }
  0x1a   :  { %1414 = vmatmul.mubr.msk.f32.gmra.mrb[6].mxu0 %vm215_vm0, %v153_v21  ;;  %1462 = vmatmul.mubr.msk.f32.gmra.mrb[6].mxu1 %vm215_vm0, %v185_v23 }
  0x1b   :  { %1416 = vmatprep.mubr.msk.f32.mxu0 %vm215_vm0, %v154_v22  ;;  %1464 = vmatprep.mubr.msk.f32.mxu1 %vm215_vm0, %v186_v24 }
  0x1e   :  { %1417 = vmatmul.mubr.msk.f32.gmra.mrb[8].mxu0 %vm215_vm0, %v155_v25  ;;  %1465 = vmatmul.mubr.msk.f32.gmra.mrb[8].mxu1 %vm215_vm0, %v187_v27 }
  0x1f   :  { %1419 = vmatprep.mubr.msk.f32.mxu0 %vm215_vm0, %v156_v26  ;;  %1467 = vmatprep.mubr.msk.f32.mxu1 %vm215_vm0, %v188_v28 }
  0x22   :  { %1420 = vmatmul.mubr.msk.f32.gmra.mrb[10].mxu0 %vm215_vm0, %v157_v29  ;;  %1468 = vmatmul.mubr.msk.f32.gmra.mrb[10].mxu1 %vm215_vm0, %v189_v31 }
  0x23   :  { %1422 = vmatprep.mubr.msk.f32.mxu0 %vm215_vm0, %v158_v30  ;;  %1470 = vmatprep.mubr.msk.f32.mxu1 %vm215_vm0, %v190_v32 }
  0x26   :  { %1423 = vmatmul.mubr.msk.f32.gmra.mrb[12].mxu0 %vm215_vm0, %v159_v33  ;;  %1471 = vmatmul.mubr.msk.f32.gmra.mrb[12].mxu1 %vm215_vm0, %v191_v35 }
  0x27   :  { %1425 = vmatprep.mubr.msk.f32.mxu0 %vm215_vm0, %v160_v34  ;;  %1473 = vmatprep.mubr.msk.f32.mxu1 %vm215_vm0, %v192_v36 }
  0x2a   :  { %1426 = vmatmul.mubr.msk.f32.gmra.mrb[14].mxu0 %vm215_vm0, %v161_v37  ;;  %1474 = vmatmul.mubr.msk.f32.gmra.mrb[14].mxu1 %vm215_vm0, %v193_v39 }
  0x2b   :  { %1428 = vmatprep.mubr.msk.f32.mxu0 %vm215_vm0, %v162_v38  ;;  %1476 = vmatprep.mubr.msk.f32.mxu1 %vm215_vm0, %v194_v40 }
  0x2e   :  { %1429 = vmatmul.mubr.msk.f32.gmra.mrb[16].mxu0 %vm215_vm0, %v163_v41  ;;  %1477 = vmatmul.mubr.msk.f32.gmra.mrb[16].mxu1 %vm215_vm0, %v195_v43 }
  0x2f   :  { %1431 = vmatprep.mubr.msk.f32.mxu0 %vm215_vm0, %v164_v42  ;;  %1479 = vmatprep.mubr.msk.f32.mxu1 %vm215_vm0, %v196_v44 }
  0x32   :  { %1432 = vmatmul.mubr.msk.f32.gmra.mrb[18].mxu0 %vm215_vm0, %v165_v45  ;;  %1480 = vmatmul.mubr.msk.f32.gmra.mrb[18].mxu1 %vm215_vm0, %v197_v47 }
  0x33   :  { %1434 = vmatprep.mubr.msk.f32.mxu0 %vm215_vm0, %v166_v46  ;;  %1482 = vmatprep.mubr.msk.f32.mxu1 %vm215_vm0, %v198_v48 }
  0x36   :  { %1435 = vmatmul.mubr.msk.f32.gmra.mrb[20].mxu0 %vm215_vm0, %v167_v49  ;;  %1483 = vmatmul.mubr.msk.f32.gmra.mrb[20].mxu1 %vm215_vm0, %v199_v51 }
  0x37   :  { %1437 = vmatprep.mubr.msk.f32.mxu0 %vm215_vm0, %v168_v50  ;;  %1485 = vmatprep.mubr.msk.f32.mxu1 %vm215_vm0, %v200_v52 }
  0x3a   :  { %1438 = vmatmul.mubr.msk.f32.gmra.mrb[22].mxu0 %vm215_vm0, %v169_v53  ;;  %1486 = vmatmul.mubr.msk.f32.gmra.mrb[22].mxu1 %vm215_vm0, %v201_v55 }
  0x3b   :  { %1440 = vmatprep.mubr.msk.f32.mxu0 %vm215_vm0, %v170_v54  ;;  %1488 = vmatprep.mubr.msk.f32.mxu1 %vm215_vm0, %v202_v56 }
  0x3e   :  { %1441 = vmatmul.mubr.msk.f32.gmra.mrb[24].mxu0 %vm215_vm0, %v171_v57  ;;  %1489 = vmatmul.mubr.msk.f32.gmra.mrb[24].mxu1 %vm215_vm0, %v203_v59 }
  0x3f   :  { %1443 = vmatprep.mubr.msk.f32.mxu0 %vm215_vm0, %v172_v58  ;;  %1491 = vmatprep.mubr.msk.f32.mxu1 %vm215_vm0, %v204_v60 }
  0x42   :  { %1444 = vmatmul.mubr.msk.f32.gmra.mrb[26].mxu0 %vm215_vm0, %v173_v61  ;;  %1492 = vmatmul.mubr.msk.f32.gmra.mrb[26].mxu1 %vm215_vm0, %v205_v63 }
  0x43   :  { %1446 = vmatprep.mubr.msk.f32.mxu0 %vm215_vm0, %v174_v62  ;;  %1494 = vmatprep.mubr.msk.f32.mxu1 %vm215_vm0, %v206_v0 }
  0x46   :  { %1447 = vmatmul.mubr.msk.f32.gmra.mrb[28].mxu0 %vm215_vm0, %v175_v1  ;;  %1495 = vmatmul.mubr.msk.f32.gmra.mrb[28].mxu1 %vm215_vm0, %v207_v3 }
  0x47   :  { %1449 = vmatprep.mubr.msk.f32.mxu0 %vm215_vm0, %v176_v2  ;;  %1497 = vmatprep.mubr.msk.f32.mxu1 %vm215_vm0, %v208_v4 }
  0x4a   :  { %1450 = vmatmul.mubr.msk.f32.gmra.mrb[30].mxu0 %vm215_vm0, %v177_v5  ;;  %1498 = vmatmul.mubr.msk.f32.gmra.mrb[30].mxu1 %vm215_vm0, %v209_v6 }
  0xe1   :  { %v1406_v7 = vpop.f32.mrb[0].mxu0  ;;  %v1813_v10 = vpop.f32.mrb[0].mxu1 }
  0xe2   :  { %993 = vst [vmem:[%s2202_s2 + $0x8] sm:$0xff] %v1406_v7  ;;  %v1121_v8 = vmul.f32 %v1406_v7, %v1406_v7  ;;  %v478_v9 = vpop.f32.mrb[1].mxu0  ;;  %1025 = vst [vmem:[%s2202_s2 + $0x108] sm:$0xff] %v1813_v10  ;;  %v1822_v13 = vpop.f32.mrb[1].mxu1 }
  0xe3   :  { %992 = vst [vmem:[%s2202_s2] sm:$0xff] %v478_v9  ;;  %v1056_v11 = vadd.f32 %v1406_v7, %v478_v9  ;;  %v1120_v12 = vmul.f32 %v478_v9, %v478_v9  ;;  %1024 = vst [vmem:[%s2202_s2 + $0x100] sm:$0xff] %v1822_v13 }
  0xe5   :  { %v1184_v14 = vadd.f32 %v1121_v8, %v1120_v12  ;;  %v1409_v15 = vpop.f32.mrb[2].mxu0  ;;  %v1831_v17 = vpop.f32.mrb[2].mxu1 }
  0xe6   :  { %995 = vst [vmem:[%s2202_s2 + $0x18] sm:$0xff] %v1409_v15  ;;  %v488_v16 = vpop.f32.mrb[3].mxu0  ;;  %1027 = vst [vmem:[%s2202_s2 + $0x118] sm:$0xff] %v1831_v17  ;;  %v1840_v20 = vpop.f32.mrb[3].mxu1  ;;  %v1123_v21 = vmul.f32 %v1409_v15, %v1409_v15 }
  0xe7   :  { %994 = vst [vmem:[%s2202_s2 + $0x10] sm:$0xff] %v488_v16  ;;  %v1057_v18 = vadd.f32 %v1056_v11, %v488_v16  ;;  %v1122_v19 = vmul.f32 %v488_v16, %v488_v16  ;;  %1026 = vst [vmem:[%s2202_s2 + $0x110] sm:$0xff] %v1840_v20 }
  0xe9   :  { %v1185_v22 = vadd.f32 %v1184_v14, %v1122_v19  ;;  %v1412_v23 = vpop.f32.mrb[4].mxu0  ;;  %v1058_v24 = vadd.f32 %v1409_v15, %v1057_v18  ;;  %v1849_v26 = vpop.f32.mrb[4].mxu1 }
  0xea   :  { %997 = vst [vmem:[%s2202_s2 + $0x28] sm:$0xff] %v1412_v23  ;;  %v498_v25 = vpop.f32.mrb[5].mxu0  ;;  %1029 = vst [vmem:[%s2202_s2 + $0x128] sm:$0xff] %v1849_v26  ;;  %v1858_v30 = vpop.f32.mrb[5].mxu1  ;;  %v1125_v31 = vmul.f32 %v1412_v23, %v1412_v23 }
  0xeb   :  { %996 = vst [vmem:[%s2202_s2 + $0x20] sm:$0xff] %v498_v25  ;;  %v1059_v27 = vadd.f32 %v1058_v24, %v498_v25  ;;  %v1124_v28 = vmul.f32 %v498_v25, %v498_v25  ;;  %v1186_v29 = vadd.f32 %v1185_v22, %v1123_v21  ;;  %1028 = vst [vmem:[%s2202_s2 + $0x120] sm:$0xff] %v1858_v30 }
  0xed   :  { %v1187_v32 = vadd.f32 %v1186_v29, %v1124_v28  ;;  %v1415_v33 = vpop.f32.mrb[6].mxu0  ;;  %v1060_v34 = vadd.f32 %v1412_v23, %v1059_v27  ;;  %v1867_v36 = vpop.f32.mrb[6].mxu1 }
  0xee   :  { %999 = vst [vmem:[%s2202_s2 + $0x38] sm:$0xff] %v1415_v33  ;;  %v508_v35 = vpop.f32.mrb[7].mxu0  ;;  %1031 = vst [vmem:[%s2202_s2 + $0x138] sm:$0xff] %v1867_v36  ;;  %v1876_v40 = vpop.f32.mrb[7].mxu1  ;;  %v1127_v41 = vmul.f32 %v1415_v33, %v1415_v33 }
  0xef   :  { %998 = vst [vmem:[%s2202_s2 + $0x30] sm:$0xff] %v508_v35  ;;  %v1061_v37 = vadd.f32 %v1060_v34, %v508_v35  ;;  %v1126_v38 = vmul.f32 %v508_v35, %v508_v35  ;;  %v1188_v39 = vadd.f32 %v1187_v32, %v1125_v31  ;;  %1030 = vst [vmem:[%s2202_s2 + $0x130] sm:$0xff] %v1876_v40 }
  0xf1   :  { %v1189_v42 = vadd.f32 %v1188_v39, %v1126_v38  ;;  %v1418_v43 = vpop.f32.mrb[8].mxu0  ;;  %v1062_v44 = vadd.f32 %v1415_v33, %v1061_v37  ;;  %v1885_v46 = vpop.f32.mrb[8].mxu1 }
  0xf2   :  { %1001 = vst [vmem:[%s2202_s2 + $0x48] sm:$0xff] %v1418_v43  ;;  %v518_v45 = vpop.f32.mrb[9].mxu0  ;;  %1033 = vst [vmem:[%s2202_s2 + $0x148] sm:$0xff] %v1885_v46  ;;  %v1894_v50 = vpop.f32.mrb[9].mxu1  ;;  %v1129_v51 = vmul.f32 %v1418_v43, %v1418_v43 }
  0xf3   :  { %1000 = vst [vmem:[%s2202_s2 + $0x40] sm:$0xff] %v518_v45  ;;  %v1063_v47 = vadd.f32 %v1062_v44, %v518_v45  ;;  %v1128_v48 = vmul.f32 %v518_v45, %v518_v45  ;;  %v1190_v49 = vadd.f32 %v1189_v42, %v1127_v41  ;;  %1032 = vst [vmem:[%s2202_s2 + $0x140] sm:$0xff] %v1894_v50 }
  0xf5   :  { %v1191_v52 = vadd.f32 %v1190_v49, %v1128_v48  ;;  %v1421_v53 = vpop.f32.mrb[10].mxu0  ;;  %v1064_v54 = vadd.f32 %v1418_v43, %v1063_v47  ;;  %v1903_v56 = vpop.f32.mrb[10].mxu1 }
  0xf6   :  { %1003 = vst [vmem:[%s2202_s2 + $0x58] sm:$0xff] %v1421_v53  ;;  %v528_v55 = vpop.f32.mrb[11].mxu0  ;;  %1035 = vst [vmem:[%s2202_s2 + $0x158] sm:$0xff] %v1903_v56  ;;  %v1912_v60 = vpop.f32.mrb[11].mxu1  ;;  %v1131_v61 = vmul.f32 %v1421_v53, %v1421_v53 }
  0xf7   :  { %1002 = vst [vmem:[%s2202_s2 + $0x50] sm:$0xff] %v528_v55  ;;  %v1065_v57 = vadd.f32 %v1064_v54, %v528_v55  ;;  %v1130_v58 = vmul.f32 %v528_v55, %v528_v55  ;;  %v1192_v59 = vadd.f32 %v1191_v52, %v1129_v51  ;;  %1034 = vst [vmem:[%s2202_s2 + $0x150] sm:$0xff] %v1912_v60 }
  0xf9   :  { %v1193_v62 = vadd.f32 %v1192_v59, %v1130_v58  ;;  %v1424_v63 = vpop.f32.mrb[12].mxu0  ;;  %v1066_v0 = vadd.f32 %v1421_v53, %v1065_v57  ;;  %v1921_v2 = vpop.f32.mrb[12].mxu1 }
  0xfa   :  { %1005 = vst [vmem:[%s2202_s2 + $0x68] sm:$0xff] %v1424_v63  ;;  %v538_v1 = vpop.f32.mrb[13].mxu0  ;;  %1037 = vst [vmem:[%s2202_s2 + $0x168] sm:$0xff] %v1921_v2  ;;  %v1930_v6 = vpop.f32.mrb[13].mxu1  ;;  %v1133_v7 = vmul.f32 %v1424_v63, %v1424_v63 }
  0xfb   :  { %1004 = vst [vmem:[%s2202_s2 + $0x60] sm:$0xff] %v538_v1  ;;  %v1067_v3 = vadd.f32 %v1066_v0, %v538_v1  ;;  %v1132_v4 = vmul.f32 %v538_v1, %v538_v1  ;;  %v1194_v5 = vadd.f32 %v1193_v62, %v1131_v61  ;;  %1036 = vst [vmem:[%s2202_s2 + $0x160] sm:$0xff] %v1930_v6 }
  0xfd   :  { %v1195_v8 = vadd.f32 %v1194_v5, %v1132_v4  ;;  %v1427_v9 = vpop.f32.mrb[14].mxu0  ;;  %v1068_v11 = vadd.f32 %v1424_v63, %v1067_v3  ;;  %v1939_v14 = vpop.f32.mrb[14].mxu1 }
  0xfe   :  { %1007 = vst [vmem:[%s2202_s2 + $0x78] sm:$0xff] %v1427_v9  ;;  %v548_v12 = vpop.f32.mrb[15].mxu0  ;;  %1039 = vst [vmem:[%s2202_s2 + $0x178] sm:$0xff] %v1939_v14  ;;  %v1948_v19 = vpop.f32.mrb[15].mxu1  ;;  %v1135_v21 = vmul.f32 %v1427_v9, %v1427_v9 }
  0xff   :  { %1006 = vst [vmem:[%s2202_s2 + $0x70] sm:$0xff] %v548_v12  ;;  %v1069_v15 = vadd.f32 %v1068_v11, %v548_v12  ;;  %v1134_v16 = vmul.f32 %v548_v12, %v548_v12  ;;  %v1196_v18 = vadd.f32 %v1195_v8, %v1133_v7  ;;  %1038 = vst [vmem:[%s2202_s2 + $0x170] sm:$0xff] %v1948_v19 }
 0x101   :  { %v1197_v22 = vadd.f32 %v1196_v18, %v1134_v16  ;;  %v1430_v23 = vpop.f32.mrb[16].mxu0  ;;  %v1070_v24 = vadd.f32 %v1427_v9, %v1069_v15  ;;  %v1957_v27 = vpop.f32.mrb[16].mxu1 }
 0x102   :  { %1009 = vst [vmem:[%s2202_s2 + $0x88] sm:$0xff] %v1430_v23  ;;  %v558_v25 = vpop.f32.mrb[17].mxu0  ;;  %1041 = vst [vmem:[%s2202_s2 + $0x188] sm:$0xff] %v1957_v27  ;;  %v1966_v32 = vpop.f32.mrb[17].mxu1  ;;  %v1137_v33 = vmul.f32 %v1430_v23, %v1430_v23 }
 0x103   :  { %1008 = vst [vmem:[%s2202_s2 + $0x80] sm:$0xff] %v558_v25  ;;  %v1071_v28 = vadd.f32 %v1070_v24, %v558_v25  ;;  %v1136_v29 = vmul.f32 %v558_v25, %v558_v25  ;;  %v1198_v31 = vadd.f32 %v1197_v22, %v1135_v21  ;;  %1040 = vst [vmem:[%s2202_s2 + $0x180] sm:$0xff] %v1966_v32 }
 0x105   :  { %v1199_v34 = vadd.f32 %v1198_v31, %v1136_v29  ;;  %v1433_v35 = vpop.f32.mrb[18].mxu0  ;;  %v1072_v37 = vadd.f32 %v1430_v23, %v1071_v28  ;;  %v1975_v39 = vpop.f32.mrb[18].mxu1 }
 0x106   :  { %1011 = vst [vmem:[%s2202_s2 + $0x98] sm:$0xff] %v1433_v35  ;;  %v568_v38 = vpop.f32.mrb[19].mxu0  ;;  %1043 = vst [vmem:[%s2202_s2 + $0x198] sm:$0xff] %v1975_v39  ;;  %v1984_v44 = vpop.f32.mrb[19].mxu1  ;;  %v1139_v45 = vmul.f32 %v1433_v35, %v1433_v35 }
 0x107   :  { %1010 = vst [vmem:[%s2202_s2 + $0x90] sm:$0xff] %v568_v38  ;;  %v1073_v41 = vadd.f32 %v1072_v37, %v568_v38  ;;  %v1138_v42 = vmul.f32 %v568_v38, %v568_v38  ;;  %v1200_v43 = vadd.f32 %v1199_v34, %v1137_v33  ;;  %1042 = vst [vmem:[%s2202_s2 + $0x190] sm:$0xff] %v1984_v44 }
 0x109   :  { %v1201_v47 = vadd.f32 %v1200_v43, %v1138_v42  ;;  %v1436_v48 = vpop.f32.mrb[20].mxu0  ;;  %v1074_v49 = vadd.f32 %v1433_v35, %v1073_v41  ;;  %v1993_v52 = vpop.f32.mrb[20].mxu1 }
 0x10a   :  { %1013 = vst [vmem:[%s2202_s2 + $0xa8] sm:$0xff] %v1436_v48  ;;  %v578_v51 = vpop.f32.mrb[21].mxu0  ;;  %1045 = vst [vmem:[%s2202_s2 + $0x1a8] sm:$0xff] %v1993_v52  ;;  %v2002_v57 = vpop.f32.mrb[21].mxu1  ;;  %v1141_v58 = vmul.f32 %v1436_v48, %v1436_v48 }
 0x10b   :  { %1012 = vst [vmem:[%s2202_s2 + $0xa0] sm:$0xff] %v578_v51  ;;  %v1075_v53 = vadd.f32 %v1074_v49, %v578_v51  ;;  %v1140_v54 = vmul.f32 %v578_v51, %v578_v51  ;;  %v1202_v55 = vadd.f32 %v1201_v47, %v1139_v45  ;;  %1044 = vst [vmem:[%s2202_s2 + $0x1a0] sm:$0xff] %v2002_v57 }
 0x10d   :  { %v1203_v59 = vadd.f32 %v1202_v55, %v1140_v54  ;;  %v1439_v61 = vpop.f32.mrb[22].mxu0  ;;  %v1076_v62 = vadd.f32 %v1436_v48, %v1075_v53  ;;  %v2011_v0 = vpop.f32.mrb[22].mxu1 }
 0x10e   :  { %1015 = vst [vmem:[%s2202_s2 + $0xb8] sm:$0xff] %v1439_v61  ;;  %v588_v63 = vpop.f32.mrb[23].mxu0  ;;  %1047 = vst [vmem:[%s2202_s2 + $0x1b8] sm:$0xff] %v2011_v0  ;;  %v2020_v5 = vpop.f32.mrb[23].mxu1  ;;  %v1143_v7 = vmul.f32 %v1439_v61, %v1439_v61 }
 0x10f   :  { %1014 = vst [vmem:[%s2202_s2 + $0xb0] sm:$0xff] %v588_v63  ;;  %v1077_v1 = vadd.f32 %v1076_v62, %v588_v63  ;;  %v1142_v3 = vmul.f32 %v588_v63, %v588_v63  ;;  %v1204_v4 = vadd.f32 %v1203_v59, %v1141_v58  ;;  %1046 = vst [vmem:[%s2202_s2 + $0x1b0] sm:$0xff] %v2020_v5 }
 0x111   :  { %v1205_v8 = vadd.f32 %v1204_v4, %v1142_v3  ;;  %v1442_v9 = vpop.f32.mrb[24].mxu0  ;;  %v1078_v11 = vadd.f32 %v1439_v61, %v1077_v1  ;;  %v2029_v15 = vpop.f32.mrb[24].mxu1 }
 0x112   :  { %1017 = vst [vmem:[%s2202_s2 + $0xc8] sm:$0xff] %v1442_v9  ;;  %v598_v12 = vpop.f32.mrb[25].mxu0  ;;  %1049 = vst [vmem:[%s2202_s2 + $0x1c8] sm:$0xff] %v2029_v15  ;;  %v2038_v22 = vpop.f32.mrb[25].mxu1  ;;  %v1145_v23 = vmul.f32 %v1442_v9, %v1442_v9 }
 0x113   :  { %1016 = vst [vmem:[%s2202_s2 + $0xc0] sm:$0xff] %v598_v12  ;;  %v1079_v16 = vadd.f32 %v1078_v11, %v598_v12  ;;  %v1144_v18 = vmul.f32 %v598_v12, %v598_v12  ;;  %v1206_v21 = vadd.f32 %v1205_v8, %v1143_v7  ;;  %1048 = vst [vmem:[%s2202_s2 + $0x1c0] sm:$0xff] %v2038_v22 }
 0x114   :  { %v1152_v11 = vmul.f32 %v1822_v13, %v1822_v13 }
 0x115   :  { %v1207_v24 = vadd.f32 %v1206_v21, %v1144_v18  ;;  %v1445_v25 = vpop.f32.mrb[26].mxu0  ;;  %v1080_v28 = vadd.f32 %v1442_v9, %v1079_v16  ;;  %v2047_v31 = vpop.f32.mrb[26].mxu1  ;;  %v1153_v18 = vmul.f32 %v1813_v10, %v1813_v10 }
 0x116   :  { %1019 = vst [vmem:[%s2202_s2 + $0xd8] sm:$0xff] %v1445_v25  ;;  %v608_v29 = vpop.f32.mrb[27].mxu0  ;;  %1051 = vst [vmem:[%s2202_s2 + $0x1d8] sm:$0xff] %v2047_v31  ;;  %v2056_v37 = vpop.f32.mrb[27].mxu1  ;;  %v1147_v38 = vmul.f32 %v1445_v25, %v1445_v25 }
 0x117   :  { %1018 = vst [vmem:[%s2202_s2 + $0xd0] sm:$0xff] %v608_v29  ;;  %v1081_v33 = vadd.f32 %v1080_v28, %v608_v29  ;;  %v1146_v34 = vmul.f32 %v608_v29, %v608_v29  ;;  %v1208_v35 = vadd.f32 %v1207_v24, %v1145_v23  ;;  %1050 = vst [vmem:[%s2202_s2 + $0x1d0] sm:$0xff] %v2056_v37 }
 0x118   :  { %v1154_v24 = vmul.f32 %v1840_v20, %v1840_v20  ;;  %v1155_v29 = vmul.f32 %v1831_v17, %v1831_v17 }
 0x119   :  { %v1209_v41 = vadd.f32 %v1208_v35, %v1146_v34  ;;  %v1448_v42 = vpop.f32.mrb[28].mxu0  ;;  %v1082_v43 = vadd.f32 %v1445_v25, %v1081_v33  ;;  %v2065_v47 = vpop.f32.mrb[28].mxu1 }
 0x11a   :  { %1021 = vst [vmem:[%s2202_s2 + $0xe8] sm:$0xff] %v1448_v42  ;;  %v618_v45 = vpop.f32.mrb[29].mxu0  ;;  %1053 = vst [vmem:[%s2202_s2 + $0x1e8] sm:$0xff] %v2065_v47  ;;  %v2074_v53 = vpop.f32.mrb[29].mxu1  ;;  %v1149_v54 = vmul.f32 %v1448_v42, %v1448_v42 }
 0x11b   :  { %1020 = vst [vmem:[%s2202_s2 + $0xe0] sm:$0xff] %v618_v45  ;;  %v1083_v48 = vadd.f32 %v1082_v43, %v618_v45  ;;  %v1148_v49 = vmul.f32 %v618_v45, %v618_v45  ;;  %v1210_v51 = vadd.f32 %v1209_v41, %v1147_v38  ;;  %1052 = vst [vmem:[%s2202_s2 + $0x1e0] sm:$0xff] %v2074_v53 }
 0x11d   :  { %v1211_v55 = vadd.f32 %v1210_v51, %v1148_v49  ;;  %v1451_v58 = vpop.f32.mrb[30].mxu0  ;;  %v1084_v59 = vadd.f32 %v1448_v42, %v1083_v48  ;;  %v2083_v62 = vpop.f32.mrb[30].mxu1 }
 0x11e   :  { %1023 = vst [vmem:[%s2202_s2 + $0xf8] sm:$0xff] %v1451_v58  ;;  %v628_v61 = vpop.f32.mrb[31].mxu0  ;;  %1055 = vst [vmem:[%s2202_s2 + $0x1f8] sm:$0xff] %v2083_v62  ;;  %v2092_v4 = vpop.f32.mrb[31].mxu1  ;;  %v1151_v7 = vmul.f32 %v1451_v58, %v1451_v58 }
 0x11f   :  { %1022 = vst [vmem:[%s2202_s2 + $0xf0] sm:$0xff] %v628_v61  ;;  %v1085_v63 = vadd.f32 %v1084_v59, %v628_v61  ;;  %v1150_v1 = vmul.f32 %v628_v61, %v628_v61  ;;  %v1212_v3 = vadd.f32 %v1211_v55, %v1149_v54  ;;  %1054 = vst [vmem:[%s2202_s2 + $0x1f0] sm:$0xff] %v2092_v4 }
 0x121   :  { %v1086_v8 = vadd.f32 %v1451_v58, %v1085_v63  ;;  %v1213_v9 = vadd.f32 %v1212_v3, %v1150_v1 }
 0x123   :  { %v1214_v12 = vadd.f32 %v1213_v9, %v1151_v7  ;;  %v1087_v16 = vadd.f32 %v1086_v8, %v1822_v13  ;;  %v1156_v13 = vmul.f32 %v1858_v30, %v1858_v30 }
 0x125   :  { %v1215_v21 = vadd.f32 %v1214_v12, %v1152_v11  ;;  %v1088_v23 = vadd.f32 %v1813_v10, %v1087_v16  ;;  %v1157_v10 = vmul.f32 %v1849_v26, %v1849_v26 }
 0x127   :  { %v1089_v25 = vadd.f32 %v1088_v23, %v1840_v20  ;;  %v1216_v28 = vadd.f32 %v1215_v21, %v1153_v18  ;;  %v1158_v20 = vmul.f32 %v1876_v40, %v1876_v40 }
 0x129   :  { %v1217_v33 = vadd.f32 %v1216_v28, %v1154_v24  ;;  %v1090_v34 = vadd.f32 %v1831_v17, %v1089_v25  ;;  %v1159_v17 = vmul.f32 %v1867_v36, %v1867_v36 }
 0x12b   :  { %v1091_v35 = vadd.f32 %v1090_v34, %v1858_v30  ;;  %v1218_v38 = vadd.f32 %v1217_v33, %v1155_v29  ;;  %v1160_v30 = vmul.f32 %v1894_v50, %v1894_v50 }
 0x12d   :  { %v1219_v41 = vadd.f32 %v1218_v38, %v1156_v13  ;;  %v1092_v42 = vadd.f32 %v1849_v26, %v1091_v35  ;;  %v1161_v26 = vmul.f32 %v1885_v46, %v1885_v46 }
 0x12f   :  { %v1093_v43 = vadd.f32 %v1092_v42, %v1876_v40  ;;  %v1220_v45 = vadd.f32 %v1219_v41, %v1157_v10  ;;  %v1162_v40 = vmul.f32 %v1912_v60, %v1912_v60 }
 0x131   :  { %v1221_v48 = vadd.f32 %v1220_v45, %v1158_v20  ;;  %v1094_v49 = vadd.f32 %v1867_v36, %v1093_v43  ;;  %v1163_v36 = vmul.f32 %v1903_v56, %v1903_v56 }
 0x133   :  { %v1095_v51 = vadd.f32 %v1094_v49, %v1894_v50  ;;  %v1222_v54 = vadd.f32 %v1221_v48, %v1159_v17  ;;  %v1164_v50 = vmul.f32 %v1930_v6, %v1930_v6 }
 0x135   :  { %v1223_v55 = vadd.f32 %v1222_v54, %v1160_v30  ;;  %v1096_v58 = vadd.f32 %v1885_v46, %v1095_v51  ;;  %v1165_v46 = vmul.f32 %v1921_v2, %v1921_v2 }
 0x137   :  { %v1097_v59 = vadd.f32 %v1096_v58, %v1912_v60  ;;  %v1224_v61 = vadd.f32 %v1223_v55, %v1161_v26  ;;  %v1166_v60 = vmul.f32 %v1948_v19, %v1948_v19 }
 0x139   :  { %v1225_v63 = vadd.f32 %v1224_v61, %v1162_v40  ;;  %v1098_v1 = vadd.f32 %v1903_v56, %v1097_v59  ;;  %v1167_v56 = vmul.f32 %v1939_v14, %v1939_v14 }
 0x13b   :  { %v1099_v3 = vadd.f32 %v1098_v1, %v1930_v6  ;;  %v1226_v7 = vadd.f32 %v1225_v63, %v1163_v36  ;;  %v1168_v6 = vmul.f32 %v1966_v32, %v1966_v32 }
 0x13d   :  { %v1227_v8 = vadd.f32 %v1226_v7, %v1164_v50  ;;  %v1100_v9 = vadd.f32 %v1921_v2, %v1099_v3  ;;  %v1169_v2 = vmul.f32 %v1957_v27, %v1957_v27 }
 0x13f   :  { %v1101_v11 = vadd.f32 %v1100_v9, %v1948_v19  ;;  %v1228_v12 = vadd.f32 %v1227_v8, %v1165_v46  ;;  %v1170_v19 = vmul.f32 %v1984_v44, %v1984_v44 }
 0x141   :  { %v1229_v16 = vadd.f32 %v1228_v12, %v1166_v60  ;;  %v1102_v18 = vadd.f32 %v1939_v14, %v1101_v11  ;;  %v1171_v14 = vmul.f32 %v1975_v39, %v1975_v39 }
 0x143   :  { %v1103_v21 = vadd.f32 %v1102_v18, %v1966_v32  ;;  %v1230_v23 = vadd.f32 %v1229_v16, %v1167_v56  ;;  %v1172_v32 = vmul.f32 %v2002_v57, %v2002_v57 }
 0x145   :  { %v1231_v24 = vadd.f32 %v1230_v23, %v1168_v6  ;;  %v1104_v25 = vadd.f32 %v1957_v27, %v1103_v21  ;;  %v1173_v27 = vmul.f32 %v1993_v52, %v1993_v52 }
 0x147   :  { %v1105_v28 = vadd.f32 %v1104_v25, %v1984_v44  ;;  %v1232_v29 = vadd.f32 %v1231_v24, %v1169_v2  ;;  %v1174_v44 = vmul.f32 %v2020_v5, %v2020_v5 }
 0x149   :  { %v1233_v33 = vadd.f32 %v1232_v29, %v1170_v19  ;;  %v1106_v34 = vadd.f32 %v1975_v39, %v1105_v28  ;;  %v1175_v39 = vmul.f32 %v2011_v0, %v2011_v0 }
 0x14b   :  { %v1107_v13 = vadd.f32 %v1106_v34, %v2002_v57  ;;  %v1234_v35 = vadd.f32 %v1233_v33, %v1171_v14  ;;  %v1176_v57 = vmul.f32 %v2038_v22, %v2038_v22 }
 0x14d   :  { %v1235_v38 = vadd.f32 %v1234_v35, %v1172_v32  ;;  %v1108_v10 = vadd.f32 %v1993_v52, %v1107_v13  ;;  %v1177_v52 = vmul.f32 %v2029_v15, %v2029_v15 }
 0x14f   :  { %v1109_v41 = vadd.f32 %v1108_v10, %v2020_v5  ;;  %v1236_v42 = vadd.f32 %v1235_v38, %v1173_v27  ;;  %v1178_v5 = vmul.f32 %v2056_v37, %v2056_v37 }
 0x151   :  { %v1237_v20 = vadd.f32 %v1236_v42, %v1174_v44  ;;  %v1110_v43 = vadd.f32 %v2011_v0, %v1109_v41  ;;  %v1179_v0 = vmul.f32 %v2047_v31, %v2047_v31 }
 0x153   :  { %v1111_v45 = vadd.f32 %v1110_v43, %v2038_v22  ;;  %v1238_v17 = vadd.f32 %v1237_v20, %v1175_v39  ;;  %v1180_v22 = vmul.f32 %v2074_v53, %v2074_v53 }
 0x155   :  { %v1239_v48 = vadd.f32 %v1238_v17, %v1176_v57  ;;  %v1112_v49 = vadd.f32 %v2029_v15, %v1111_v45  ;;  %v1181_v15 = vmul.f32 %v2065_v47, %v2065_v47 }
 0x157   :  { %v1113_v30 = vadd.f32 %v1112_v49, %v2056_v37  ;;  %v1240_v51 = vadd.f32 %v1239_v48, %v1177_v52  ;;  %v1182_v37 = vmul.f32 %v2092_v4, %v2092_v4 }
 0x159   :  { %v1241_v54 = vadd.f32 %v1240_v51, %v1178_v5  ;;  %v1114_v26 = vadd.f32 %v2047_v31, %v1113_v30  ;;  %v1183_v31 = vmul.f32 %v2083_v62, %v2083_v62 }
 0x15b   :  { %v1115_v55 = vadd.f32 %v1114_v26, %v2074_v53  ;;  %v1242_v58 = vadd.f32 %v1241_v54, %v1179_v0 }
 0x15d   :  { %v1243_v40 = vadd.f32 %v1242_v58, %v1180_v22  ;;  %v1116_v59 = vadd.f32 %v2065_v47, %v1115_v55 }
 0x15f   :  { %v1117_v61 = vadd.f32 %v1116_v59, %v2092_v4  ;;  %v1244_v36 = vadd.f32 %v1243_v40, %v1181_v15 }
 0x161   :  { %v1118_v63 = vadd.f32 %v2083_v62, %v1117_v61  ;;  %v1245_v1 = vadd.f32 %v1244_v36, %v1182_v37 }
 0x163   :  { %1119 = vst [vmem:[%s2203_s3] sm:$0xff] %v1118_v63  ;;  %v1246_v53 = vadd.f32 %v1245_v1, %v1183_v31 }
 0x165   :  { %1247 = vst [vmem:[%s2204_s4] sm:$0xff] %v1246_v53 }

</bundles_post_ra>
